<compile_context>
chip_gen: v5e
topology: v5e:2x2
jax: 0.10.0
libtpu: 0.0.40
codegen_flags: <defaults>
</compile_context>

<pallas_src>
import jax
import jax.numpy as jnp
from jax import lax
from jax.experimental import pallas as pl
from jax.experimental.pallas import tpu as pltpu

_LANE = 128
_SUB = 16   # sublane multiple safe for both f32 (8) and packed bf16 (16)


def _ceil_to(x, m):
    return ((x + m - 1) // m) * m


# ----------------------------------------------------------------------------
# Fused kernel (built per static layer structure)
# ----------------------------------------------------------------------------
def _build_vae_kernel(T, enc_hp, dec_hp, out_dp, chunk, unroll):
    """Ref order:
       inputs : x, (w_ih, w_hh, b) * n_enc, mean_w, mean_b,
                (w_ih, w_hh, b) * n_dec, out_w, out_b
       outputs: o
       scratch: two ping-pong (T, B_tile, Hmax) bf16 sequence buffers.
       Weights pre-transposed: w_ih (D_in, H), w_hh (H, H), b (1, H)."""
    n_enc, n_dec = len(enc_hp), len(dec_hp)
    f32, bf16 = jnp.float32, jnp.bfloat16

    # Static T-chunk boundaries for the hoisted projections.
    bounds = []
    t0 = 0
    while t0 < T:
        t1 = min(t0 + chunk, T)
        bounds.append((t0, t1))
        t0 = t1

    def kernel(*refs):
        pos = 0
        x_ref = refs[pos]; pos += 1
        enc = [refs[pos + 3 * l: pos + 3 * l + 3] for l in range(n_enc)]
        pos += 3 * n_enc
        mean_w_ref, mean_b_ref = refs[pos], refs[pos + 1]; pos += 2
        dec = [refs[pos + 3 * l: pos + 3 * l + 3] for l in range(n_dec)]
        pos += 3 * n_dec
        out_w_ref, out_b_ref = refs[pos], refs[pos + 1]; pos += 2
        o_ref = refs[pos]; pos += 1
        bufs = (refs[pos], refs[pos + 1]); pos += 2

        B = x_ref.shape[1]

        def project_seq(read_fn, d_in, w_ref, b_ref, dst_buf, H):
            """dst_buf[t0:t1, :, :H] = read_fn(t0, t1) @ W + b, chunked (MXU)."""
            w = w_ref[...]
            b = b_ref[...]
            for (t0, t1) in bounds:
                n = t1 - t0
                src = read_fn(t0, t1)                          # (n, B, d_in) bf16
                pre = jnp.dot(src.reshape(n * B, d_in), w,
                              preferred_element_type=f32) + b
                dst_buf[t0:t1, :, :H] = pre.reshape(n, B, H).astype(bf16)

        def recur(pre_fn, w_hh_ref, store_buf, H):
            """h_t = tanh(pre_fn(t) + h_{t-1} @ W_hh); h carried in f32."""
            w_hh = w_hh_ref[...]                               # loaded once/layer

            def step(t, h):
                z = jnp.dot(h.astype(bf16), w_hh, preferred_element_type=f32)
                h_new = jnp.tanh(pre_fn(t) + z)
                if store_buf is not None:
                    store_buf[t, :, :H] = h_new.astype(bf16)
                return h_new

            return lax.fori_loop(0, T, step, jnp.zeros((B, H), f32),
                                 unroll=unroll)

        # ------------------------- encoder RNN stack -------------------------
        slot = 0
        prev_read = lambda t0, t1: x_ref[t0:t1]
        prev_d = x_ref.shape[-1]
        h_last = None
        for l in range(n_enc):
            w_ih_ref, w_hh_ref, b_ref = enc[l]
            H = enc_hp[l]
            buf = bufs[slot]
            project_seq(prev_read, prev_d, w_ih_ref, b_ref, buf, H)
            is_last = (l == n_enc - 1)
            h_last = recur(lambda t, buf=buf, H=H: buf[t, :, :H].astype(f32),
                           w_hh_ref,
                           None if is_last else buf,   # last layer: only h_last
                           H)
            prev_read = lambda t0, t1, buf=buf, H=H: buf[t0:t1, :, :H]
            prev_d = H
            slot = 1 - slot

        # ----------------- latent encoder (eval: mean only) ------------------
        emb = jnp.dot(h_last.astype(bf16), mean_w_ref[...],
                      preferred_element_type=f32) + mean_b_ref[...]

        # ------------------------- decoder RNN stack -------------------------
        for l in range(n_dec):
            w_ih_ref, w_hh_ref, b_ref = dec[l]
            H = dec_hp[l]
            buf = bufs[slot]
            if l == 0:
                # Time-constant input: single (B,E)@(E,H) matmul, no (T,B,E).
                pre0 = jnp.dot(emb.astype(bf16), w_ih_ref[...],
                               preferred_element_type=f32) + b_ref[...]
                recur(lambda t, pre0=pre0: pre0, w_hh_ref, buf, H)
            else:
                project_seq(prev_read, prev_d, w_ih_ref, b_ref, buf, H)
                recur(lambda t, buf=buf, H=H: buf[t, :, :H].astype(f32),
                      w_hh_ref, buf, H)
            prev_read = lambda t0, t1, buf=buf, H=H: buf[t0:t1, :, :H]
            prev_d = H
            slot = 1 - slot

        # ------ output projection: chunked big matmul, lane-dense store ------
        out_w = out_w_ref[...]
        out_b = out_b_ref[...]
        for (t0, t1) in bounds:
            n = t1 - t0
            src = prev_read(t0, t1)                            # (n, B, Hd) bf16
            y = jnp.dot(src.reshape(n * B, prev_d), out_w,
                        preferred_element_type=f32) + out_b
            o_ref[t0:t1] = y.reshape(n, B, out_dp)

    return kernel


# ----------------------------------------------------------------------------
# Wrapper: padding / layout plumbing / VMEM budgeting + pallas_call
# ----------------------------------------------------------------------------
def _pad2(a, rows_p, cols_p, dtype):
    a = jnp.pad(a, ((0, rows_p - a.shape[0]), (0, cols_p - a.shape[1])))
    return a.astype(dtype)


def _device_is_v7():
    try:
        return "v7" in jax.devices()[0].device_kind.lower()
    except Exception:
        return False


@jax.jit
def sequence_vae_forward(x_btd, params):
    f32, bf16 = jnp.float32, jnp.bfloat16
    B, T, D_in = x_btd.shape

    enc_hidden = [w_hh.shape[0] for (_, w_hh, _) in params["enc_rnn"]]
    dec_hidden = [w_hh.shape[0] for (_, w_hh, _) in params["dec_rnn"]]
    E = params["mean_w"].shape[0]

    Dp = _ceil_to(D_in, _LANE)
    Ep = _ceil_to(E, _LANE)
    enc_Hp = [_ceil_to(h, _LANE) for h in enc_hidden]
    dec_Hp = [_ceil_to(h, _LANE) for h in dec_hidden]
    Hmax = max(enc_Hp + dec_Hp)

    # ---- static weight VMEM footprint (bf16 matrices, f32 biases) ----
    weight_bytes = 0
    d_prev = Dp
    for Hp in enc_Hp:
        weight_bytes += (d_prev * Hp + Hp * Hp) * 2 + Hp * 4
        d_prev = Hp
    weight_bytes += enc_Hp[-1] * Ep * 2 + Ep * 4
    d_prev = Ep
    for Hp in dec_Hp:
        weight_bytes += (d_prev * Hp + Hp * Hp) * 2 + Hp * 4
        d_prev = Hp
    weight_bytes += dec_Hp[-1] * Dp * 2 + Dp * 4

    # ---- generation-aware batch tiling + VMEM budgeting ----
    is_v7 = _device_is_v7()
    budget = (40 << 20) if is_v7 else (80 << 20)       # target working set
    vmem_cap = (56 << 20) if is_v7 else (110 << 20)    # scoped-VMEM ceiling

    def est(bt):
        seq = 2 * T * bt * Hmax * 2        # two bf16 ping-pong seq buffers
        xin = 2 * T * bt * Dp * 2          # double-buffered bf16 input block
        out = 2 * T * bt * Dp * 4          # double-buffered f32 output block
        return seq + xin + out + 2 * weight_bytes + (4 << 20)   # + proj temps

    Bp0 = _ceil_to(B, _SUB)
    # v7x: split batch across >=2 grid tiles (2nd TensorCore); v5e/v6e: one
    # large tile (grid steps are serial on a single TC), shrink only for VMEM.
    n_tiles = 2 if (is_v7 and Bp0 >= 2 * _SUB) else 1
    while True:
        B_tile = _ceil_to(-(-Bp0 // n_tiles), _SUB)
        if est(B_tile) <= budget or B_tile <= _SUB:
            break
        n_tiles *= 2
    Bp = _ceil_to(Bp0, B_tile)
    grid = (Bp // B_tile,)
    vmem_limit = int(min(max(est(B_tile) * 1.3, 32 << 20), vmem_cap))

    # Chunk size for the hoisted projections (bounds the f32 temporary ~2 MiB).
    denom = max(1, B_tile * max(Hmax, Dp) * 4)
    chunk = max(1, min(T, (2 << 20) // denom))

    # Unroll the recurrence only while the carried h fits comfortably in vregs.
    carry_bytes = B_tile * Hmax * 4
    if carry_bytes <= (64 << 10):
        unroll = min(T, 8)
    elif carry_bytes <= (128 << 10):
        unroll = min(T, 4)
    else:
        unroll = min(T, 2)

    # ---- input: time-major, zero-padded, bf16 ----
    x_tm = jnp.transpose(x_btd, (1, 0, 2)).astype(f32)            # (T, B, D)
    x_p = jnp.pad(x_tm, ((0, 0), (0, Bp - B), (0, Dp - D_in))).astype(bf16)

    inputs = [x_p]
    in_specs = [pl.BlockSpec((T, B_tile, Dp), lambda i: (0, i, 0))]

    def add_weight(w, rows_p, cols_p, dtype):
        inputs.append(_pad2(w.astype(f32), rows_p, cols_p, dtype))
        in_specs.append(pl.BlockSpec((rows_p, cols_p), lambda i: (0, 0)))

    # Encoder RNN stack: pre-transposed weights, combined bias.
    d_prev_p = Dp
    for (w_ih, w_hh, b), Hp in zip(params["enc_rnn"], enc_Hp):
        add_weight(w_ih.T, d_prev_p, Hp, bf16)
        add_weight(w_hh.T, Hp, Hp, bf16)
        add_weight(b, 1, Hp, f32)
        d_prev_p = Hp

    # Latent mean head.
    add_weight(params["mean_w"].T, enc_Hp[-1], Ep, bf16)
    add_weight(params["mean_b"], 1, Ep, f32)

    # Decoder RNN stack.
    d_prev_p = Ep
    for (w_ih, w_hh, b), Hp in zip(params["dec_rnn"], dec_Hp):
        add_weight(w_ih.T, d_prev_p, Hp, bf16)
        add_weight(w_hh.T, Hp, Hp, bf16)
        add_weight(b, 1, Hp, f32)
        d_prev_p = Hp

    # Output projection.
    add_weight(params["out_w"].T, dec_Hp[-1], Dp, bf16)
    add_weight(params["out_b"], 1, Dp, f32)

    # Two ping-pong bf16 sequence buffers (only producer+consumer live).
    scratch = [pltpu.VMEM((T, B_tile, Hmax), bf16) for _ in range(2)]

    kernel = _build_vae_kernel(T, enc_Hp, dec_Hp, Dp, chunk, unroll)

    out_p = pl.pallas_call(
        kernel,
        out_shape=jax.ShapeDtypeStruct((T, Bp, Dp), f32),
        grid_spec=pltpu.PrefetchScalarGridSpec(
            num_scalar_prefetch=0,
            grid=grid,
            in_specs=in_specs,
            out_specs=pl.BlockSpec((T, B_tile, Dp), lambda i: (0, i, 0)),
            scratch_shapes=scratch,
        ),
        compiler_params=pltpu.CompilerParams(
            dimension_semantics=("parallel",),
            vmem_limit_bytes=vmem_limit,
        ),
    )(*inputs)

    out = out_p[:, :B, :D_in]               # (T, B, input_dim)
    return jnp.transpose(out, (1, 0, 2))    # (B, T, input_dim)


# ----------------------------------------------------------------------------
# Deterministic parameter construction (shapes implied by the module __init__)
# ----------------------------------------------------------------------------
def _uniform(key, shape, bound):
    return jax.random.uniform(key, shape, jnp.float32, -bound, bound)


def _xavier_uniform(key, shape):
    fan_out, fan_in = shape
    bound = (6.0 / (fan_in + fan_out)) ** 0.5
    return jax.random.uniform(key, shape, jnp.float32, -bound, bound)


def make_params(key, input_dim, hidden_dims, embedding_dim):
    params = {}

    def rnn_stack(key, in_dim, dims):
        layers = []
        d_in = in_dim
        for h in dims:
            key, k1, k2, k3, k4 = jax.random.split(key, 5)
            bound = 1.0 / (h ** 0.5)               # PyTorch nn.RNN default init
            w_ih = _uniform(k1, (h, d_in), bound)
            w_hh = _uniform(k2, (h, h), bound)
            b = _uniform(k3, (1, h), bound) + _uniform(k4, (1, h), bound)
            layers.append((w_ih, w_hh, b))
            d_in = h
        return key, layers

    key, params["enc_rnn"] = rnn_stack(key, input_dim, hidden_dims)

    # LatentEncoder.hidden_to_mean (xavier_uniform weight, default bias).
    key, k_w, k_b = jax.random.split(key, 3)
    params["mean_w"] = _xavier_uniform(k_w, (embedding_dim, hidden_dims[-1]))
    params["mean_b"] = _uniform(k_b, (1, embedding_dim),
                                1.0 / (hidden_dims[-1] ** 0.5))

    dec_dims = hidden_dims[::-1]
    key, params["dec_rnn"] = rnn_stack(key, embedding_dim, dec_dims)

    # Decoder output projection: hidden_dims[::-1][-1] -> input_dim.
    key, k_w, k_b = jax.random.split(key, 3)
    bound = 1.0 / (dec_dims[-1] ** 0.5)
    params["out_w"] = _uniform(k_w, (input_dim, dec_dims[-1]), bound)
    params["out_b"] = _uniform(k_b, (1, input_dim), bound)
    return params


# ----------------------------------------------------------------------------
if __name__ == "__main__":
    # Small shapes consistent with the module: batch=2, seq=8, input_dim=4,
    # hidden_dims=[32, 16], embedding_dim=8.
    B, T, D = 2, 8, 4
    hidden_dims = [32, 16]
    embedding_dim = 8

    key = jax.random.PRNGKey(0)
    key, kx, kp = jax.random.split(key, 3)
    x = jax.random.normal(kx, (B, T, D), dtype=jnp.float32)
    params = make_params(kp, D, hidden_dims, embedding_dim)

    out = sequence_vae_forward(x, params)
    jax.block_until_ready(out)

    assert out.shape == (B, T, D), out.shape
    assert out.dtype == jnp.float32
    print("KERNEL_OK")
</pallas_src>

<mosaic_0001>
module attributes {stable_mosaic.version = 11 : i64} {
  func.func @kernel(%arg0: i32, %arg1: memref<8x16x128xbf16, #tpu.memory_space<vmem>>, %arg2: memref<128x128xbf16, #tpu.memory_space<vmem>>, %arg3: memref<128x128xbf16, #tpu.memory_space<vmem>>, %arg4: memref<1x128xf32, #tpu.memory_space<vmem>>, %arg5: memref<128x128xbf16, #tpu.memory_space<vmem>>, %arg6: memref<128x128xbf16, #tpu.memory_space<vmem>>, %arg7: memref<1x128xf32, #tpu.memory_space<vmem>>, %arg8: memref<128x128xbf16, #tpu.memory_space<vmem>>, %arg9: memref<1x128xf32, #tpu.memory_space<vmem>>, %arg10: memref<128x128xbf16, #tpu.memory_space<vmem>>, %arg11: memref<128x128xbf16, #tpu.memory_space<vmem>>, %arg12: memref<1x128xf32, #tpu.memory_space<vmem>>, %arg13: memref<128x128xbf16, #tpu.memory_space<vmem>>, %arg14: memref<128x128xbf16, #tpu.memory_space<vmem>>, %arg15: memref<1x128xf32, #tpu.memory_space<vmem>>, %arg16: memref<128x128xbf16, #tpu.memory_space<vmem>>, %arg17: memref<1x128xf32, #tpu.memory_space<vmem>>, %arg18: memref<8x16x128xf32, #tpu.memory_space<vmem>>, %arg19: memref<8x16x128xbf16, #tpu.memory_space<vmem>>, %arg20: memref<8x16x128xbf16, #tpu.memory_space<vmem>>) attributes {dimension_semantics = [#tpu.dimension_semantics<parallel>], iteration_bounds = array<i64: 1>, scalar_prefetch = 0 : i64, scratch_operands = 2 : i64, tpu.core_type = #tpu.core_type<tc>, window_params = [{transform_indices = @transform_0, window_bounds = array<i64: 8, 16, 128>}, {pipeline_mode = #tpu.pipeline_mode<synchronous>, transform_indices = @transform_1, window_bounds = array<i64: 128, 128>}, {pipeline_mode = #tpu.pipeline_mode<synchronous>, transform_indices = @transform_2, window_bounds = array<i64: 128, 128>}, {pipeline_mode = #tpu.pipeline_mode<synchronous>, transform_indices = @transform_3, window_bounds = array<i64: 1, 128>}, {pipeline_mode = #tpu.pipeline_mode<synchronous>, transform_indices = @transform_4, window_bounds = array<i64: 128, 128>}, {pipeline_mode = #tpu.pipeline_mode<synchronous>, transform_indices = @transform_5, window_bounds = array<i64: 128, 128>}, {pipeline_mode = #tpu.pipeline_mode<synchronous>, transform_indices = @transform_6, window_bounds = array<i64: 1, 128>}, {pipeline_mode = #tpu.pipeline_mode<synchronous>, transform_indices = @transform_7, window_bounds = array<i64: 128, 128>}, {pipeline_mode = #tpu.pipeline_mode<synchronous>, transform_indices = @transform_8, window_bounds = array<i64: 1, 128>}, {pipeline_mode = #tpu.pipeline_mode<synchronous>, transform_indices = @transform_9, window_bounds = array<i64: 128, 128>}, {pipeline_mode = #tpu.pipeline_mode<synchronous>, transform_indices = @transform_10, window_bounds = array<i64: 128, 128>}, {pipeline_mode = #tpu.pipeline_mode<synchronous>, transform_indices = @transform_11, window_bounds = array<i64: 1, 128>}, {pipeline_mode = #tpu.pipeline_mode<synchronous>, transform_indices = @transform_12, window_bounds = array<i64: 128, 128>}, {pipeline_mode = #tpu.pipeline_mode<synchronous>, transform_indices = @transform_13, window_bounds = array<i64: 128, 128>}, {pipeline_mode = #tpu.pipeline_mode<synchronous>, transform_indices = @transform_14, window_bounds = array<i64: 1, 128>}, {pipeline_mode = #tpu.pipeline_mode<synchronous>, transform_indices = @transform_15, window_bounds = array<i64: 128, 128>}, {pipeline_mode = #tpu.pipeline_mode<synchronous>, transform_indices = @transform_16, window_bounds = array<i64: 1, 128>}, {transform_indices = @transform_17, window_bounds = array<i64: 8, 16, 128>}]} {
    %c0 = arith.constant 0 : index
    %c0_0 = arith.constant 0 : index
    %0 = vector.load %arg2[%c0, %c0_0] : memref<128x128xbf16, #tpu.memory_space<vmem>>, vector<128x128xbf16>
    %c0_1 = arith.constant 0 : index
    %c0_2 = arith.constant 0 : index
    %1 = vector.load %arg4[%c0_1, %c0_2] : memref<1x128xf32, #tpu.memory_space<vmem>>, vector<1x128xf32>
    %c0_3 = arith.constant 0 : index
    %c0_4 = arith.constant 0 : index
    %c0_5 = arith.constant 0 : index
    %2 = vector.load %arg1[%c0_3, %c0_4, %c0_5] : memref<8x16x128xbf16, #tpu.memory_space<vmem>>, vector<8x16x128xbf16>
    %3 = vector.shape_cast %2 : vector<8x16x128xbf16> to vector<128x128xbf16>
    %cst = arith.constant dense<0.000000e+00> : vector<128x128xf32>
    %4 = tpu.matmul %3, %0, %cst {dimension_numbers = #tpu.dot_dimension_numbers<[1], [0], [0], [1], [0, 0, 1, 1], [], []>} : vector<128x128xbf16>, vector<128x128xbf16>, vector<128x128xf32> -> vector<128x128xf32>
    %5 = vector.broadcast %1 : vector<1x128xf32> to vector<128x128xf32>
    %6 = arith.addf %4, %5 : vector<128x128xf32>
    %7 = vector.shape_cast %6 : vector<128x128xf32> to vector<8x16x128xf32>
    %8 = arith.truncf %7 : vector<8x16x128xf32> to vector<8x16x128xbf16>
    %c0_6 = arith.constant 0 : index
    %c0_7 = arith.constant 0 : index
    %c0_8 = arith.constant 0 : index
    %9 = vector.load %arg19[%c0_6, %c0_7, %c0_8] : memref<8x16x128xbf16, #tpu.memory_space<vmem>>, vector<8x16x128xbf16>
    tpu.vector_store %arg19[%c0_6, %c0_7, %c0_8], %8 {strides = array<i32>} : memref<8x16x128xbf16, #tpu.memory_space<vmem>>, vector<8x16x128xbf16>,
    %c0_9 = arith.constant 0 : index
    %c0_10 = arith.constant 0 : index
    %10 = vector.load %arg3[%c0_9, %c0_10] : memref<128x128xbf16, #tpu.memory_space<vmem>>, vector<128x128xbf16>
    %cst_11 = arith.constant 0.000000e+00 : f32
    %11 = vector.broadcast %cst_11 : f32 to vector<16x128xf32>
    %c0_i32 = arith.constant 0 : i32
    %12 = arith.truncf %11 : vector<16x128xf32> to vector<16x128xbf16>
    %cst_12 = arith.constant dense<0.000000e+00> : vector<16x128xf32>
    %13 = tpu.matmul %12, %10, %cst_12 {dimension_numbers = #tpu.dot_dimension_numbers<[1], [0], [0], [1], [0, 0, 1, 1], [], []>} : vector<16x128xbf16>, vector<128x128xbf16>, vector<16x128xf32> -> vector<16x128xf32>
    %14 = arith.index_cast %c0_i32 : i32 to index
    %c0_13 = arith.constant 0 : index
    %c0_14 = arith.constant 0 : index
    %15 = vector.load %arg19[%14, %c0_13, %c0_14] : memref<8x16x128xbf16, #tpu.memory_space<vmem>>, vector<1x16x128xbf16>
    %16 = vector.shape_cast %15 : vector<1x16x128xbf16> to vector<16x128xbf16>
    %17 = arith.extf %16 : vector<16x128xbf16> to vector<16x128xf32>
    %18 = arith.addf %17, %13 : vector<16x128xf32>
    %19 = math.tanh %18 : vector<16x128xf32>
    %20 = arith.truncf %19 : vector<16x128xf32> to vector<16x128xbf16>
    %21 = arith.index_cast %c0_i32 : i32 to index
    %c0_15 = arith.constant 0 : index
    %c0_16 = arith.constant 0 : index
    %22 = vector.load %arg19[%21, %c0_15, %c0_16] : memref<8x16x128xbf16, #tpu.memory_space<vmem>>, vector<1x16x128xbf16>
    %23 = vector.shape_cast %22 : vector<1x16x128xbf16> to vector<16x128xbf16>
    %24 = vector.shape_cast %20 : vector<16x128xbf16> to vector<1x16x128xbf16>
    tpu.vector_store %arg19[%21, %c0_15, %c0_16], %24 {strides = array<i32>} : memref<8x16x128xbf16, #tpu.memory_space<vmem>>, vector<1x16x128xbf16>,
    %c1_i32 = arith.constant 1 : i32
    %25 = arith.truncf %19 : vector<16x128xf32> to vector<16x128xbf16>
    %cst_17 = arith.constant dense<0.000000e+00> : vector<16x128xf32>
    %26 = tpu.matmul %25, %10, %cst_17 {dimension_numbers = #tpu.dot_dimension_numbers<[1], [0], [0], [1], [0, 0, 1, 1], [], []>} : vector<16x128xbf16>, vector<128x128xbf16>, vector<16x128xf32> -> vector<16x128xf32>
    %27 = arith.index_cast %c1_i32 : i32 to index
    %c0_18 = arith.constant 0 : index
    %c0_19 = arith.constant 0 : index
    %28 = vector.load %arg19[%27, %c0_18, %c0_19] : memref<8x16x128xbf16, #tpu.memory_space<vmem>>, vector<1x16x128xbf16>
    %29 = vector.shape_cast %28 : vector<1x16x128xbf16> to vector<16x128xbf16>
    %30 = arith.extf %29 : vector<16x128xbf16> to vector<16x128xf32>
    %31 = arith.addf %30, %26 : vector<16x128xf32>
    %32 = math.tanh %31 : vector<16x128xf32>
    %33 = arith.truncf %32 : vector<16x128xf32> to vector<16x128xbf16>
    %34 = arith.index_cast %c1_i32 : i32 to index
    %c0_20 = arith.constant 0 : index
    %c0_21 = arith.constant 0 : index
    %35 = vector.load %arg19[%34, %c0_20, %c0_21] : memref<8x16x128xbf16, #tpu.memory_space<vmem>>, vector<1x16x128xbf16>
    %36 = vector.shape_cast %35 : vector<1x16x128xbf16> to vector<16x128xbf16>
    %37 = vector.shape_cast %33 : vector<16x128xbf16> to vector<1x16x128xbf16>
    tpu.vector_store %arg19[%34, %c0_20, %c0_21], %37 {strides = array<i32>} : memref<8x16x128xbf16, #tpu.memory_space<vmem>>, vector<1x16x128xbf16>,
    %c2_i32 = arith.constant 2 : i32
    %38 = arith.truncf %32 : vector<16x128xf32> to vector<16x128xbf16>
    %cst_22 = arith.constant dense<0.000000e+00> : vector<16x128xf32>
    %39 = tpu.matmul %38, %10, %cst_22 {dimension_numbers = #tpu.dot_dimension_numbers<[1], [0], [0], [1], [0, 0, 1, 1], [], []>} : vector<16x128xbf16>, vector<128x128xbf16>, vector<16x128xf32> -> vector<16x128xf32>
    %40 = arith.index_cast %c2_i32 : i32 to index
    %c0_23 = arith.constant 0 : index
    %c0_24 = arith.constant 0 : index
    %41 = vector.load %arg19[%40, %c0_23, %c0_24] : memref<8x16x128xbf16, #tpu.memory_space<vmem>>, vector<1x16x128xbf16>
    %42 = vector.shape_cast %41 : vector<1x16x128xbf16> to vector<16x128xbf16>
    %43 = arith.extf %42 : vector<16x128xbf16> to vector<16x128xf32>
    %44 = arith.addf %43, %39 : vector<16x128xf32>
    %45 = math.tanh %44 : vector<16x128xf32>
    %46 = arith.truncf %45 : vector<16x128xf32> to vector<16x128xbf16>
    %47 = arith.index_cast %c2_i32 : i32 to index
    %c0_25 = arith.constant 0 : index
    %c0_26 = arith.constant 0 : index
    %48 = vector.load %arg19[%47, %c0_25, %c0_26] : memref<8x16x128xbf16, #tpu.memory_space<vmem>>, vector<1x16x128xbf16>
    %49 = vector.shape_cast %48 : vector<1x16x128xbf16> to vector<16x128xbf16>
    %50 = vector.shape_cast %46 : vector<16x128xbf16> to vector<1x16x128xbf16>
    tpu.vector_store %arg19[%47, %c0_25, %c0_26], %50 {strides = array<i32>} : memref<8x16x128xbf16, #tpu.memory_space<vmem>>, vector<1x16x128xbf16>,
    %c3_i32 = arith.constant 3 : i32
    %51 = arith.truncf %45 : vector<16x128xf32> to vector<16x128xbf16>
    %cst_27 = arith.constant dense<0.000000e+00> : vector<16x128xf32>
    %52 = tpu.matmul %51, %10, %cst_27 {dimension_numbers = #tpu.dot_dimension_numbers<[1], [0], [0], [1], [0, 0, 1, 1], [], []>} : vector<16x128xbf16>, vector<128x128xbf16>, vector<16x128xf32> -> vector<16x128xf32>
    %53 = arith.index_cast %c3_i32 : i32 to index
    %c0_28 = arith.constant 0 : index
    %c0_29 = arith.constant 0 : index
    %54 = vector.load %arg19[%53, %c0_28, %c0_29] : memref<8x16x128xbf16, #tpu.memory_space<vmem>>, vector<1x16x128xbf16>
    %55 = vector.shape_cast %54 : vector<1x16x128xbf16> to vector<16x128xbf16>
    %56 = arith.extf %55 : vector<16x128xbf16> to vector<16x128xf32>
    %57 = arith.addf %56, %52 : vector<16x128xf32>
    %58 = math.tanh %57 : vector<16x128xf32>
    %59 = arith.truncf %58 : vector<16x128xf32> to vector<16x128xbf16>
    %60 = arith.index_cast %c3_i32 : i32 to index
    %c0_30 = arith.constant 0 : index
    %c0_31 = arith.constant 0 : index
    %61 = vector.load %arg19[%60, %c0_30, %c0_31] : memref<8x16x128xbf16, #tpu.memory_space<vmem>>, vector<1x16x128xbf16>
    %62 = vector.shape_cast %61 : vector<1x16x128xbf16> to vector<16x128xbf16>
    %63 = vector.shape_cast %59 : vector<16x128xbf16> to vector<1x16x128xbf16>
    tpu.vector_store %arg19[%60, %c0_30, %c0_31], %63 {strides = array<i32>} : memref<8x16x128xbf16, #tpu.memory_space<vmem>>, vector<1x16x128xbf16>,
    %c4_i32 = arith.constant 4 : i32
    %64 = arith.truncf %58 : vector<16x128xf32> to vector<16x128xbf16>
    %cst_32 = arith.constant dense<0.000000e+00> : vector<16x128xf32>
    %65 = tpu.matmul %64, %10, %cst_32 {dimension_numbers = #tpu.dot_dimension_numbers<[1], [0], [0], [1], [0, 0, 1, 1], [], []>} : vector<16x128xbf16>, vector<128x128xbf16>, vector<16x128xf32> -> vector<16x128xf32>
    %66 = arith.index_cast %c4_i32 : i32 to index
    %c0_33 = arith.constant 0 : index
    %c0_34 = arith.constant 0 : index
    %67 = vector.load %arg19[%66, %c0_33, %c0_34] : memref<8x16x128xbf16, #tpu.memory_space<vmem>>, vector<1x16x128xbf16>
    %68 = vector.shape_cast %67 : vector<1x16x128xbf16> to vector<16x128xbf16>
    %69 = arith.extf %68 : vector<16x128xbf16> to vector<16x128xf32>
    %70 = arith.addf %69, %65 : vector<16x128xf32>
    %71 = math.tanh %70 : vector<16x128xf32>
    %72 = arith.truncf %71 : vector<16x128xf32> to vector<16x128xbf16>
    %73 = arith.index_cast %c4_i32 : i32 to index
    %c0_35 = arith.constant 0 : index
    %c0_36 = arith.constant 0 : index
    %74 = vector.load %arg19[%73, %c0_35, %c0_36] : memref<8x16x128xbf16, #tpu.memory_space<vmem>>, vector<1x16x128xbf16>
    %75 = vector.shape_cast %74 : vector<1x16x128xbf16> to vector<16x128xbf16>
    %76 = vector.shape_cast %72 : vector<16x128xbf16> to vector<1x16x128xbf16>
    tpu.vector_store %arg19[%73, %c0_35, %c0_36], %76 {strides = array<i32>} : memref<8x16x128xbf16, #tpu.memory_space<vmem>>, vector<1x16x128xbf16>,
    %c5_i32 = arith.constant 5 : i32
    %77 = arith.truncf %71 : vector<16x128xf32> to vector<16x128xbf16>
    %cst_37 = arith.constant dense<0.000000e+00> : vector<16x128xf32>
    %78 = tpu.matmul %77, %10, %cst_37 {dimension_numbers = #tpu.dot_dimension_numbers<[1], [0], [0], [1], [0, 0, 1, 1], [], []>} : vector<16x128xbf16>, vector<128x128xbf16>, vector<16x128xf32> -> vector<16x128xf32>
    %79 = arith.index_cast %c5_i32 : i32 to index
    %c0_38 = arith.constant 0 : index
    %c0_39 = arith.constant 0 : index
    %80 = vector.load %arg19[%79, %c0_38, %c0_39] : memref<8x16x128xbf16, #tpu.memory_space<vmem>>, vector<1x16x128xbf16>
    %81 = vector.shape_cast %80 : vector<1x16x128xbf16> to vector<16x128xbf16>
    %82 = arith.extf %81 : vector<16x128xbf16> to vector<16x128xf32>
    %83 = arith.addf %82, %78 : vector<16x128xf32>
    %84 = math.tanh %83 : vector<16x128xf32>
    %85 = arith.truncf %84 : vector<16x128xf32> to vector<16x128xbf16>
    %86 = arith.index_cast %c5_i32 : i32 to index
    %c0_40 = arith.constant 0 : index
    %c0_41 = arith.constant 0 : index
    %87 = vector.load %arg19[%86, %c0_40, %c0_41] : memref<8x16x128xbf16, #tpu.memory_space<vmem>>, vector<1x16x128xbf16>
    %88 = vector.shape_cast %87 : vector<1x16x128xbf16> to vector<16x128xbf16>
    %89 = vector.shape_cast %85 : vector<16x128xbf16> to vector<1x16x128xbf16>
    tpu.vector_store %arg19[%86, %c0_40, %c0_41], %89 {strides = array<i32>} : memref<8x16x128xbf16, #tpu.memory_space<vmem>>, vector<1x16x128xbf16>,
    %c6_i32 = arith.constant 6 : i32
    %90 = arith.truncf %84 : vector<16x128xf32> to vector<16x128xbf16>
    %cst_42 = arith.constant dense<0.000000e+00> : vector<16x128xf32>
    %91 = tpu.matmul %90, %10, %cst_42 {dimension_numbers = #tpu.dot_dimension_numbers<[1], [0], [0], [1], [0, 0, 1, 1], [], []>} : vector<16x128xbf16>, vector<128x128xbf16>, vector<16x128xf32> -> vector<16x128xf32>
    %92 = arith.index_cast %c6_i32 : i32 to index
    %c0_43 = arith.constant 0 : index
    %c0_44 = arith.constant 0 : index
    %93 = vector.load %arg19[%92, %c0_43, %c0_44] : memref<8x16x128xbf16, #tpu.memory_space<vmem>>, vector<1x16x128xbf16>
    %94 = vector.shape_cast %93 : vector<1x16x128xbf16> to vector<16x128xbf16>
    %95 = arith.extf %94 : vector<16x128xbf16> to vector<16x128xf32>
    %96 = arith.addf %95, %91 : vector<16x128xf32>
    %97 = math.tanh %96 : vector<16x128xf32>
    %98 = arith.truncf %97 : vector<16x128xf32> to vector<16x128xbf16>
    %99 = arith.index_cast %c6_i32 : i32 to index
    %c0_45 = arith.constant 0 : index
    %c0_46 = arith.constant 0 : index
    %100 = vector.load %arg19[%99, %c0_45, %c0_46] : memref<8x16x128xbf16, #tpu.memory_space<vmem>>, vector<1x16x128xbf16>
    %101 = vector.shape_cast %100 : vector<1x16x128xbf16> to vector<16x128xbf16>
    %102 = vector.shape_cast %98 : vector<16x128xbf16> to vector<1x16x128xbf16>
    tpu.vector_store %arg19[%99, %c0_45, %c0_46], %102 {strides = array<i32>} : memref<8x16x128xbf16, #tpu.memory_space<vmem>>, vector<1x16x128xbf16>,
    %c7_i32 = arith.constant 7 : i32
    %103 = arith.truncf %97 : vector<16x128xf32> to vector<16x128xbf16>
    %cst_47 = arith.constant dense<0.000000e+00> : vector<16x128xf32>
    %104 = tpu.matmul %103, %10, %cst_47 {dimension_numbers = #tpu.dot_dimension_numbers<[1], [0], [0], [1], [0, 0, 1, 1], [], []>} : vector<16x128xbf16>, vector<128x128xbf16>, vector<16x128xf32> -> vector<16x128xf32>
    %105 = arith.index_cast %c7_i32 : i32 to index
    %c0_48 = arith.constant 0 : index
    %c0_49 = arith.constant 0 : index
    %106 = vector.load %arg19[%105, %c0_48, %c0_49] : memref<8x16x128xbf16, #tpu.memory_space<vmem>>, vector<1x16x128xbf16>
    %107 = vector.shape_cast %106 : vector<1x16x128xbf16> to vector<16x128xbf16>
    %108 = arith.extf %107 : vector<16x128xbf16> to vector<16x128xf32>
    %109 = arith.addf %108, %104 : vector<16x128xf32>
    %110 = math.tanh %109 : vector<16x128xf32>
    %111 = arith.truncf %110 : vector<16x128xf32> to vector<16x128xbf16>
    %112 = arith.index_cast %c7_i32 : i32 to index
    %c0_50 = arith.constant 0 : index
    %c0_51 = arith.constant 0 : index
    %113 = vector.load %arg19[%112, %c0_50, %c0_51] : memref<8x16x128xbf16, #tpu.memory_space<vmem>>, vector<1x16x128xbf16>
    %114 = vector.shape_cast %113 : vector<1x16x128xbf16> to vector<16x128xbf16>
    %115 = vector.shape_cast %111 : vector<16x128xbf16> to vector<1x16x128xbf16>
    tpu.vector_store %arg19[%112, %c0_50, %c0_51], %115 {strides = array<i32>} : memref<8x16x128xbf16, #tpu.memory_space<vmem>>, vector<1x16x128xbf16>,
    %c8_i32 = arith.constant 8 : i32
    %c0_52 = arith.constant 0 : index
    %c0_53 = arith.constant 0 : index
    %116 = vector.load %arg5[%c0_52, %c0_53] : memref<128x128xbf16, #tpu.memory_space<vmem>>, vector<128x128xbf16>
    %c0_54 = arith.constant 0 : index
    %c0_55 = arith.constant 0 : index
    %117 = vector.load %arg7[%c0_54, %c0_55] : memref<1x128xf32, #tpu.memory_space<vmem>>, vector<1x128xf32>
    %c0_56 = arith.constant 0 : index
    %c0_57 = arith.constant 0 : index
    %c0_58 = arith.constant 0 : index
    %118 = vector.load %arg19[%c0_56, %c0_57, %c0_58] : memref<8x16x128xbf16, #tpu.memory_space<vmem>>, vector<8x16x128xbf16>
    %119 = vector.shape_cast %118 : vector<8x16x128xbf16> to vector<128x128xbf16>
    %cst_59 = arith.constant dense<0.000000e+00> : vector<128x128xf32>
    %120 = tpu.matmul %119, %116, %cst_59 {dimension_numbers = #tpu.dot_dimension_numbers<[1], [0], [0], [1], [0, 0, 1, 1], [], []>} : vector<128x128xbf16>, vector<128x128xbf16>, vector<128x128xf32> -> vector<128x128xf32>
    %121 = vector.broadcast %117 : vector<1x128xf32> to vector<128x128xf32>
    %122 = arith.addf %120, %121 : vector<128x128xf32>
    %123 = vector.shape_cast %122 : vector<128x128xf32> to vector<8x16x128xf32>
    %124 = arith.truncf %123 : vector<8x16x128xf32> to vector<8x16x128xbf16>
    %c0_60 = arith.constant 0 : index
    %c0_61 = arith.constant 0 : index
    %c0_62 = arith.constant 0 : index
    %125 = vector.load %arg20[%c0_60, %c0_61, %c0_62] : memref<8x16x128xbf16, #tpu.memory_space<vmem>>, vector<8x16x128xbf16>
    tpu.vector_store %arg20[%c0_60, %c0_61, %c0_62], %124 {strides = array<i32>} : memref<8x16x128xbf16, #tpu.memory_space<vmem>>, vector<8x16x128xbf16>,
    %c0_63 = arith.constant 0 : index
    %c0_64 = arith.constant 0 : index
    %126 = vector.load %arg6[%c0_63, %c0_64] : memref<128x128xbf16, #tpu.memory_space<vmem>>, vector<128x128xbf16>
    %cst_65 = arith.constant 0.000000e+00 : f32
    %127 = vector.broadcast %cst_65 : f32 to vector<16x128xf32>
    %c0_i32_66 = arith.constant 0 : i32
    %128 = arith.truncf %127 : vector<16x128xf32> to vector<16x128xbf16>
    %cst_67 = arith.constant dense<0.000000e+00> : vector<16x128xf32>
    %129 = tpu.matmul %128, %126, %cst_67 {dimension_numbers = #tpu.dot_dimension_numbers<[1], [0], [0], [1], [0, 0, 1, 1], [], []>} : vector<16x128xbf16>, vector<128x128xbf16>, vector<16x128xf32> -> vector<16x128xf32>
    %130 = arith.index_cast %c0_i32_66 : i32 to index
    %c0_68 = arith.constant 0 : index
    %c0_69 = arith.constant 0 : index
    %131 = vector.load %arg20[%130, %c0_68, %c0_69] : memref<8x16x128xbf16, #tpu.memory_space<vmem>>, vector<1x16x128xbf16>
    %132 = vector.shape_cast %131 : vector<1x16x128xbf16> to vector<16x128xbf16>
    %133 = arith.extf %132 : vector<16x128xbf16> to vector<16x128xf32>
    %134 = arith.addf %133, %129 : vector<16x128xf32>
    %135 = math.tanh %134 : vector<16x128xf32>
    %c1_i32_70 = arith.constant 1 : i32
    %136 = arith.truncf %135 : vector<16x128xf32> to vector<16x128xbf16>
    %cst_71 = arith.constant dense<0.000000e+00> : vector<16x128xf32>
    %137 = tpu.matmul %136, %126, %cst_71 {dimension_numbers = #tpu.dot_dimension_numbers<[1], [0], [0], [1], [0, 0, 1, 1], [], []>} : vector<16x128xbf16>, vector<128x128xbf16>, vector<16x128xf32> -> vector<16x128xf32>
    %138 = arith.index_cast %c1_i32_70 : i32 to index
    %c0_72 = arith.constant 0 : index
    %c0_73 = arith.constant 0 : index
    %139 = vector.load %arg20[%138, %c0_72, %c0_73] : memref<8x16x128xbf16, #tpu.memory_space<vmem>>, vector<1x16x128xbf16>
    %140 = vector.shape_cast %139 : vector<1x16x128xbf16> to vector<16x128xbf16>
    %141 = arith.extf %140 : vector<16x128xbf16> to vector<16x128xf32>
    %142 = arith.addf %141, %137 : vector<16x128xf32>
    %143 = math.tanh %142 : vector<16x128xf32>
    %c2_i32_74 = arith.constant 2 : i32
    %144 = arith.truncf %143 : vector<16x128xf32> to vector<16x128xbf16>
    %cst_75 = arith.constant dense<0.000000e+00> : vector<16x128xf32>
    %145 = tpu.matmul %144, %126, %cst_75 {dimension_numbers = #tpu.dot_dimension_numbers<[1], [0], [0], [1], [0, 0, 1, 1], [], []>} : vector<16x128xbf16>, vector<128x128xbf16>, vector<16x128xf32> -> vector<16x128xf32>
    %146 = arith.index_cast %c2_i32_74 : i32 to index
    %c0_76 = arith.constant 0 : index
    %c0_77 = arith.constant 0 : index
    %147 = vector.load %arg20[%146, %c0_76, %c0_77] : memref<8x16x128xbf16, #tpu.memory_space<vmem>>, vector<1x16x128xbf16>
    %148 = vector.shape_cast %147 : vector<1x16x128xbf16> to vector<16x128xbf16>
    %149 = arith.extf %148 : vector<16x128xbf16> to vector<16x128xf32>
    %150 = arith.addf %149, %145 : vector<16x128xf32>
    %151 = math.tanh %150 : vector<16x128xf32>
    %c3_i32_78 = arith.constant 3 : i32
    %152 = arith.truncf %151 : vector<16x128xf32> to vector<16x128xbf16>
    %cst_79 = arith.constant dense<0.000000e+00> : vector<16x128xf32>
    %153 = tpu.matmul %152, %126, %cst_79 {dimension_numbers = #tpu.dot_dimension_numbers<[1], [0], [0], [1], [0, 0, 1, 1], [], []>} : vector<16x128xbf16>, vector<128x128xbf16>, vector<16x128xf32> -> vector<16x128xf32>
    %154 = arith.index_cast %c3_i32_78 : i32 to index
    %c0_80 = arith.constant 0 : index
    %c0_81 = arith.constant 0 : index
    %155 = vector.load %arg20[%154, %c0_80, %c0_81] : memref<8x16x128xbf16, #tpu.memory_space<vmem>>, vector<1x16x128xbf16>
    %156 = vector.shape_cast %155 : vector<1x16x128xbf16> to vector<16x128xbf16>
    %157 = arith.extf %156 : vector<16x128xbf16> to vector<16x128xf32>
    %158 = arith.addf %157, %153 : vector<16x128xf32>
    %159 = math.tanh %158 : vector<16x128xf32>
    %c4_i32_82 = arith.constant 4 : i32
    %160 = arith.truncf %159 : vector<16x128xf32> to vector<16x128xbf16>
    %cst_83 = arith.constant dense<0.000000e+00> : vector<16x128xf32>
    %161 = tpu.matmul %160, %126, %cst_83 {dimension_numbers = #tpu.dot_dimension_numbers<[1], [0], [0], [1], [0, 0, 1, 1], [], []>} : vector<16x128xbf16>, vector<128x128xbf16>, vector<16x128xf32> -> vector<16x128xf32>
    %162 = arith.index_cast %c4_i32_82 : i32 to index
    %c0_84 = arith.constant 0 : index
    %c0_85 = arith.constant 0 : index
    %163 = vector.load %arg20[%162, %c0_84, %c0_85] : memref<8x16x128xbf16, #tpu.memory_space<vmem>>, vector<1x16x128xbf16>
    %164 = vector.shape_cast %163 : vector<1x16x128xbf16> to vector<16x128xbf16>
    %165 = arith.extf %164 : vector<16x128xbf16> to vector<16x128xf32>
    %166 = arith.addf %165, %161 : vector<16x128xf32>
    %167 = math.tanh %166 : vector<16x128xf32>
    %c5_i32_86 = arith.constant 5 : i32
    %168 = arith.truncf %167 : vector<16x128xf32> to vector<16x128xbf16>
    %cst_87 = arith.constant dense<0.000000e+00> : vector<16x128xf32>
    %169 = tpu.matmul %168, %126, %cst_87 {dimension_numbers = #tpu.dot_dimension_numbers<[1], [0], [0], [1], [0, 0, 1, 1], [], []>} : vector<16x128xbf16>, vector<128x128xbf16>, vector<16x128xf32> -> vector<16x128xf32>
    %170 = arith.index_cast %c5_i32_86 : i32 to index
    %c0_88 = arith.constant 0 : index
    %c0_89 = arith.constant 0 : index
    %171 = vector.load %arg20[%170, %c0_88, %c0_89] : memref<8x16x128xbf16, #tpu.memory_space<vmem>>, vector<1x16x128xbf16>
    %172 = vector.shape_cast %171 : vector<1x16x128xbf16> to vector<16x128xbf16>
    %173 = arith.extf %172 : vector<16x128xbf16> to vector<16x128xf32>
    %174 = arith.addf %173, %169 : vector<16x128xf32>
    %175 = math.tanh %174 : vector<16x128xf32>
    %c6_i32_90 = arith.constant 6 : i32
    %176 = arith.truncf %175 : vector<16x128xf32> to vector<16x128xbf16>
    %cst_91 = arith.constant dense<0.000000e+00> : vector<16x128xf32>
    %177 = tpu.matmul %176, %126, %cst_91 {dimension_numbers = #tpu.dot_dimension_numbers<[1], [0], [0], [1], [0, 0, 1, 1], [], []>} : vector<16x128xbf16>, vector<128x128xbf16>, vector<16x128xf32> -> vector<16x128xf32>
    %178 = arith.index_cast %c6_i32_90 : i32 to index
    %c0_92 = arith.constant 0 : index
    %c0_93 = arith.constant 0 : index
    %179 = vector.load %arg20[%178, %c0_92, %c0_93] : memref<8x16x128xbf16, #tpu.memory_space<vmem>>, vector<1x16x128xbf16>
    %180 = vector.shape_cast %179 : vector<1x16x128xbf16> to vector<16x128xbf16>
    %181 = arith.extf %180 : vector<16x128xbf16> to vector<16x128xf32>
    %182 = arith.addf %181, %177 : vector<16x128xf32>
    %183 = math.tanh %182 : vector<16x128xf32>
    %c7_i32_94 = arith.constant 7 : i32
    %184 = arith.truncf %183 : vector<16x128xf32> to vector<16x128xbf16>
    %cst_95 = arith.constant dense<0.000000e+00> : vector<16x128xf32>
    %185 = tpu.matmul %184, %126, %cst_95 {dimension_numbers = #tpu.dot_dimension_numbers<[1], [0], [0], [1], [0, 0, 1, 1], [], []>} : vector<16x128xbf16>, vector<128x128xbf16>, vector<16x128xf32> -> vector<16x128xf32>
    %186 = arith.index_cast %c7_i32_94 : i32 to index
    %c0_96 = arith.constant 0 : index
    %c0_97 = arith.constant 0 : index
    %187 = vector.load %arg20[%186, %c0_96, %c0_97] : memref<8x16x128xbf16, #tpu.memory_space<vmem>>, vector<1x16x128xbf16>
    %188 = vector.shape_cast %187 : vector<1x16x128xbf16> to vector<16x128xbf16>
    %189 = arith.extf %188 : vector<16x128xbf16> to vector<16x128xf32>
    %190 = arith.addf %189, %185 : vector<16x128xf32>
    %191 = math.tanh %190 : vector<16x128xf32>
    %c8_i32_98 = arith.constant 8 : i32
    %192 = arith.truncf %191 : vector<16x128xf32> to vector<16x128xbf16>
    %c0_99 = arith.constant 0 : index
    %c0_100 = arith.constant 0 : index
    %193 = vector.load %arg8[%c0_99, %c0_100] : memref<128x128xbf16, #tpu.memory_space<vmem>>, vector<128x128xbf16>
    %cst_101 = arith.constant dense<0.000000e+00> : vector<16x128xf32>
    %194 = tpu.matmul %192, %193, %cst_101 {dimension_numbers = #tpu.dot_dimension_numbers<[1], [0], [0], [1], [0, 0, 1, 1], [], []>} : vector<16x128xbf16>, vector<128x128xbf16>, vector<16x128xf32> -> vector<16x128xf32>
    %c0_102 = arith.constant 0 : index
    %c0_103 = arith.constant 0 : index
    %195 = vector.load %arg9[%c0_102, %c0_103] : memref<1x128xf32, #tpu.memory_space<vmem>>, vector<1x128xf32>
    %196 = vector.broadcast %195 : vector<1x128xf32> to vector<16x128xf32>
    %197 = arith.addf %194, %196 : vector<16x128xf32>
    %198 = arith.truncf %197 : vector<16x128xf32> to vector<16x128xbf16>
    %c0_104 = arith.constant 0 : index
    %c0_105 = arith.constant 0 : index
    %199 = vector.load %arg10[%c0_104, %c0_105] : memref<128x128xbf16, #tpu.memory_space<vmem>>, vector<128x128xbf16>
    %cst_106 = arith.constant dense<0.000000e+00> : vector<16x128xf32>
    %200 = tpu.matmul %198, %199, %cst_106 {dimension_numbers = #tpu.dot_dimension_numbers<[1], [0], [0], [1], [0, 0, 1, 1], [], []>} : vector<16x128xbf16>, vector<128x128xbf16>, vector<16x128xf32> -> vector<16x128xf32>
    %c0_107 = arith.constant 0 : index
    %c0_108 = arith.constant 0 : index
    %201 = vector.load %arg12[%c0_107, %c0_108] : memref<1x128xf32, #tpu.memory_space<vmem>>, vector<1x128xf32>
    %202 = vector.broadcast %201 : vector<1x128xf32> to vector<16x128xf32>
    %203 = arith.addf %200, %202 : vector<16x128xf32>
    %c0_109 = arith.constant 0 : index
    %c0_110 = arith.constant 0 : index
    %204 = vector.load %arg11[%c0_109, %c0_110] : memref<128x128xbf16, #tpu.memory_space<vmem>>, vector<128x128xbf16>
    %cst_111 = arith.constant 0.000000e+00 : f32
    %205 = vector.broadcast %cst_111 : f32 to vector<16x128xf32>
    %c0_i32_112 = arith.constant 0 : i32
    %206 = arith.truncf %205 : vector<16x128xf32> to vector<16x128xbf16>
    %cst_113 = arith.constant dense<0.000000e+00> : vector<16x128xf32>
    %207 = tpu.matmul %206, %204, %cst_113 {dimension_numbers = #tpu.dot_dimension_numbers<[1], [0], [0], [1], [0, 0, 1, 1], [], []>} : vector<16x128xbf16>, vector<128x128xbf16>, vector<16x128xf32> -> vector<16x128xf32>
    %208 = arith.addf %203, %207 : vector<16x128xf32>
    %209 = math.tanh %208 : vector<16x128xf32>
    %210 = arith.truncf %209 : vector<16x128xf32> to vector<16x128xbf16>
    %211 = arith.index_cast %c0_i32_112 : i32 to index
    %c0_114 = arith.constant 0 : index
    %c0_115 = arith.constant 0 : index
    %212 = vector.load %arg19[%211, %c0_114, %c0_115] : memref<8x16x128xbf16, #tpu.memory_space<vmem>>, vector<1x16x128xbf16>
    %213 = vector.shape_cast %212 : vector<1x16x128xbf16> to vector<16x128xbf16>
    %214 = vector.shape_cast %210 : vector<16x128xbf16> to vector<1x16x128xbf16>
    tpu.vector_store %arg19[%211, %c0_114, %c0_115], %214 {strides = array<i32>} : memref<8x16x128xbf16, #tpu.memory_space<vmem>>, vector<1x16x128xbf16>,
    %c1_i32_116 = arith.constant 1 : i32
    %215 = arith.truncf %209 : vector<16x128xf32> to vector<16x128xbf16>
    %cst_117 = arith.constant dense<0.000000e+00> : vector<16x128xf32>
    %216 = tpu.matmul %215, %204, %cst_117 {dimension_numbers = #tpu.dot_dimension_numbers<[1], [0], [0], [1], [0, 0, 1, 1], [], []>} : vector<16x128xbf16>, vector<128x128xbf16>, vector<16x128xf32> -> vector<16x128xf32>
    %217 = arith.addf %203, %216 : vector<16x128xf32>
    %218 = math.tanh %217 : vector<16x128xf32>
    %219 = arith.truncf %218 : vector<16x128xf32> to vector<16x128xbf16>
    %220 = arith.index_cast %c1_i32_116 : i32 to index
    %c0_118 = arith.constant 0 : index
    %c0_119 = arith.constant 0 : index
    %221 = vector.load %arg19[%220, %c0_118, %c0_119] : memref<8x16x128xbf16, #tpu.memory_space<vmem>>, vector<1x16x128xbf16>
    %222 = vector.shape_cast %221 : vector<1x16x128xbf16> to vector<16x128xbf16>
    %223 = vector.shape_cast %219 : vector<16x128xbf16> to vector<1x16x128xbf16>
    tpu.vector_store %arg19[%220, %c0_118, %c0_119], %223 {strides = array<i32>} : memref<8x16x128xbf16, #tpu.memory_space<vmem>>, vector<1x16x128xbf16>,
    %c2_i32_120 = arith.constant 2 : i32
    %224 = arith.truncf %218 : vector<16x128xf32> to vector<16x128xbf16>
    %cst_121 = arith.constant dense<0.000000e+00> : vector<16x128xf32>
    %225 = tpu.matmul %224, %204, %cst_121 {dimension_numbers = #tpu.dot_dimension_numbers<[1], [0], [0], [1], [0, 0, 1, 1], [], []>} : vector<16x128xbf16>, vector<128x128xbf16>, vector<16x128xf32> -> vector<16x128xf32>
    %226 = arith.addf %203, %225 : vector<16x128xf32>
    %227 = math.tanh %226 : vector<16x128xf32>
    %228 = arith.truncf %227 : vector<16x128xf32> to vector<16x128xbf16>
    %229 = arith.index_cast %c2_i32_120 : i32 to index
    %c0_122 = arith.constant 0 : index
    %c0_123 = arith.constant 0 : index
    %230 = vector.load %arg19[%229, %c0_122, %c0_123] : memref<8x16x128xbf16, #tpu.memory_space<vmem>>, vector<1x16x128xbf16>
    %231 = vector.shape_cast %230 : vector<1x16x128xbf16> to vector<16x128xbf16>
    %232 = vector.shape_cast %228 : vector<16x128xbf16> to vector<1x16x128xbf16>
    tpu.vector_store %arg19[%229, %c0_122, %c0_123], %232 {strides = array<i32>} : memref<8x16x128xbf16, #tpu.memory_space<vmem>>, vector<1x16x128xbf16>,
    %c3_i32_124 = arith.constant 3 : i32
    %233 = arith.truncf %227 : vector<16x128xf32> to vector<16x128xbf16>
    %cst_125 = arith.constant dense<0.000000e+00> : vector<16x128xf32>
    %234 = tpu.matmul %233, %204, %cst_125 {dimension_numbers = #tpu.dot_dimension_numbers<[1], [0], [0], [1], [0, 0, 1, 1], [], []>} : vector<16x128xbf16>, vector<128x128xbf16>, vector<16x128xf32> -> vector<16x128xf32>
    %235 = arith.addf %203, %234 : vector<16x128xf32>
    %236 = math.tanh %235 : vector<16x128xf32>
    %237 = arith.truncf %236 : vector<16x128xf32> to vector<16x128xbf16>
    %238 = arith.index_cast %c3_i32_124 : i32 to index
    %c0_126 = arith.constant 0 : index
    %c0_127 = arith.constant 0 : index
    %239 = vector.load %arg19[%238, %c0_126, %c0_127] : memref<8x16x128xbf16, #tpu.memory_space<vmem>>, vector<1x16x128xbf16>
    %240 = vector.shape_cast %239 : vector<1x16x128xbf16> to vector<16x128xbf16>
    %241 = vector.shape_cast %237 : vector<16x128xbf16> to vector<1x16x128xbf16>
    tpu.vector_store %arg19[%238, %c0_126, %c0_127], %241 {strides = array<i32>} : memref<8x16x128xbf16, #tpu.memory_space<vmem>>, vector<1x16x128xbf16>,
    %c4_i32_128 = arith.constant 4 : i32
    %242 = arith.truncf %236 : vector<16x128xf32> to vector<16x128xbf16>
    %cst_129 = arith.constant dense<0.000000e+00> : vector<16x128xf32>
    %243 = tpu.matmul %242, %204, %cst_129 {dimension_numbers = #tpu.dot_dimension_numbers<[1], [0], [0], [1], [0, 0, 1, 1], [], []>} : vector<16x128xbf16>, vector<128x128xbf16>, vector<16x128xf32> -> vector<16x128xf32>
    %244 = arith.addf %203, %243 : vector<16x128xf32>
    %245 = math.tanh %244 : vector<16x128xf32>
    %246 = arith.truncf %245 : vector<16x128xf32> to vector<16x128xbf16>
    %247 = arith.index_cast %c4_i32_128 : i32 to index
    %c0_130 = arith.constant 0 : index
    %c0_131 = arith.constant 0 : index
    %248 = vector.load %arg19[%247, %c0_130, %c0_131] : memref<8x16x128xbf16, #tpu.memory_space<vmem>>, vector<1x16x128xbf16>
    %249 = vector.shape_cast %248 : vector<1x16x128xbf16> to vector<16x128xbf16>
    %250 = vector.shape_cast %246 : vector<16x128xbf16> to vector<1x16x128xbf16>
    tpu.vector_store %arg19[%247, %c0_130, %c0_131], %250 {strides = array<i32>} : memref<8x16x128xbf16, #tpu.memory_space<vmem>>, vector<1x16x128xbf16>,
    %c5_i32_132 = arith.constant 5 : i32
    %251 = arith.truncf %245 : vector<16x128xf32> to vector<16x128xbf16>
    %cst_133 = arith.constant dense<0.000000e+00> : vector<16x128xf32>
    %252 = tpu.matmul %251, %204, %cst_133 {dimension_numbers = #tpu.dot_dimension_numbers<[1], [0], [0], [1], [0, 0, 1, 1], [], []>} : vector<16x128xbf16>, vector<128x128xbf16>, vector<16x128xf32> -> vector<16x128xf32>
    %253 = arith.addf %203, %252 : vector<16x128xf32>
    %254 = math.tanh %253 : vector<16x128xf32>
    %255 = arith.truncf %254 : vector<16x128xf32> to vector<16x128xbf16>
    %256 = arith.index_cast %c5_i32_132 : i32 to index
    %c0_134 = arith.constant 0 : index
    %c0_135 = arith.constant 0 : index
    %257 = vector.load %arg19[%256, %c0_134, %c0_135] : memref<8x16x128xbf16, #tpu.memory_space<vmem>>, vector<1x16x128xbf16>
    %258 = vector.shape_cast %257 : vector<1x16x128xbf16> to vector<16x128xbf16>
    %259 = vector.shape_cast %255 : vector<16x128xbf16> to vector<1x16x128xbf16>
    tpu.vector_store %arg19[%256, %c0_134, %c0_135], %259 {strides = array<i32>} : memref<8x16x128xbf16, #tpu.memory_space<vmem>>, vector<1x16x128xbf16>,
    %c6_i32_136 = arith.constant 6 : i32
    %260 = arith.truncf %254 : vector<16x128xf32> to vector<16x128xbf16>
    %cst_137 = arith.constant dense<0.000000e+00> : vector<16x128xf32>
    %261 = tpu.matmul %260, %204, %cst_137 {dimension_numbers = #tpu.dot_dimension_numbers<[1], [0], [0], [1], [0, 0, 1, 1], [], []>} : vector<16x128xbf16>, vector<128x128xbf16>, vector<16x128xf32> -> vector<16x128xf32>
    %262 = arith.addf %203, %261 : vector<16x128xf32>
    %263 = math.tanh %262 : vector<16x128xf32>
    %264 = arith.truncf %263 : vector<16x128xf32> to vector<16x128xbf16>
    %265 = arith.index_cast %c6_i32_136 : i32 to index
    %c0_138 = arith.constant 0 : index
    %c0_139 = arith.constant 0 : index
    %266 = vector.load %arg19[%265, %c0_138, %c0_139] : memref<8x16x128xbf16, #tpu.memory_space<vmem>>, vector<1x16x128xbf16>
    %267 = vector.shape_cast %266 : vector<1x16x128xbf16> to vector<16x128xbf16>
    %268 = vector.shape_cast %264 : vector<16x128xbf16> to vector<1x16x128xbf16>
    tpu.vector_store %arg19[%265, %c0_138, %c0_139], %268 {strides = array<i32>} : memref<8x16x128xbf16, #tpu.memory_space<vmem>>, vector<1x16x128xbf16>,
    %c7_i32_140 = arith.constant 7 : i32
    %269 = arith.truncf %263 : vector<16x128xf32> to vector<16x128xbf16>
    %cst_141 = arith.constant dense<0.000000e+00> : vector<16x128xf32>
    %270 = tpu.matmul %269, %204, %cst_141 {dimension_numbers = #tpu.dot_dimension_numbers<[1], [0], [0], [1], [0, 0, 1, 1], [], []>} : vector<16x128xbf16>, vector<128x128xbf16>, vector<16x128xf32> -> vector<16x128xf32>
    %271 = arith.addf %203, %270 : vector<16x128xf32>
    %272 = math.tanh %271 : vector<16x128xf32>
    %273 = arith.truncf %272 : vector<16x128xf32> to vector<16x128xbf16>
    %274 = arith.index_cast %c7_i32_140 : i32 to index
    %c0_142 = arith.constant 0 : index
    %c0_143 = arith.constant 0 : index
    %275 = vector.load %arg19[%274, %c0_142, %c0_143] : memref<8x16x128xbf16, #tpu.memory_space<vmem>>, vector<1x16x128xbf16>
    %276 = vector.shape_cast %275 : vector<1x16x128xbf16> to vector<16x128xbf16>
    %277 = vector.shape_cast %273 : vector<16x128xbf16> to vector<1x16x128xbf16>
    tpu.vector_store %arg19[%274, %c0_142, %c0_143], %277 {strides = array<i32>} : memref<8x16x128xbf16, #tpu.memory_space<vmem>>, vector<1x16x128xbf16>,
    %c8_i32_144 = arith.constant 8 : i32
    %c0_145 = arith.constant 0 : index
    %c0_146 = arith.constant 0 : index
    %278 = vector.load %arg13[%c0_145, %c0_146] : memref<128x128xbf16, #tpu.memory_space<vmem>>, vector<128x128xbf16>
    %c0_147 = arith.constant 0 : index
    %c0_148 = arith.constant 0 : index
    %279 = vector.load %arg15[%c0_147, %c0_148] : memref<1x128xf32, #tpu.memory_space<vmem>>, vector<1x128xf32>
    %c0_149 = arith.constant 0 : index
    %c0_150 = arith.constant 0 : index
    %c0_151 = arith.constant 0 : index
    %280 = vector.load %arg19[%c0_149, %c0_150, %c0_151] : memref<8x16x128xbf16, #tpu.memory_space<vmem>>, vector<8x16x128xbf16>
    %281 = vector.shape_cast %280 : vector<8x16x128xbf16> to vector<128x128xbf16>
    %cst_152 = arith.constant dense<0.000000e+00> : vector<128x128xf32>
    %282 = tpu.matmul %281, %278, %cst_152 {dimension_numbers = #tpu.dot_dimension_numbers<[1], [0], [0], [1], [0, 0, 1, 1], [], []>} : vector<128x128xbf16>, vector<128x128xbf16>, vector<128x128xf32> -> vector<128x128xf32>
    %283 = vector.broadcast %279 : vector<1x128xf32> to vector<128x128xf32>
    %284 = arith.addf %282, %283 : vector<128x128xf32>
    %285 = vector.shape_cast %284 : vector<128x128xf32> to vector<8x16x128xf32>
    %286 = arith.truncf %285 : vector<8x16x128xf32> to vector<8x16x128xbf16>
    %c0_153 = arith.constant 0 : index
    %c0_154 = arith.constant 0 : index
    %c0_155 = arith.constant 0 : index
    %287 = vector.load %arg20[%c0_153, %c0_154, %c0_155] : memref<8x16x128xbf16, #tpu.memory_space<vmem>>, vector<8x16x128xbf16>
    tpu.vector_store %arg20[%c0_153, %c0_154, %c0_155], %286 {strides = array<i32>} : memref<8x16x128xbf16, #tpu.memory_space<vmem>>, vector<8x16x128xbf16>,
    %c0_156 = arith.constant 0 : index
    %c0_157 = arith.constant 0 : index
    %288 = vector.load %arg14[%c0_156, %c0_157] : memref<128x128xbf16, #tpu.memory_space<vmem>>, vector<128x128xbf16>
    %cst_158 = arith.constant 0.000000e+00 : f32
    %289 = vector.broadcast %cst_158 : f32 to vector<16x128xf32>
    %c0_i32_159 = arith.constant 0 : i32
    %290 = arith.truncf %289 : vector<16x128xf32> to vector<16x128xbf16>
    %cst_160 = arith.constant dense<0.000000e+00> : vector<16x128xf32>
    %291 = tpu.matmul %290, %288, %cst_160 {dimension_numbers = #tpu.dot_dimension_numbers<[1], [0], [0], [1], [0, 0, 1, 1], [], []>} : vector<16x128xbf16>, vector<128x128xbf16>, vector<16x128xf32> -> vector<16x128xf32>
    %292 = arith.index_cast %c0_i32_159 : i32 to index
    %c0_161 = arith.constant 0 : index
    %c0_162 = arith.constant 0 : index
    %293 = vector.load %arg20[%292, %c0_161, %c0_162] : memref<8x16x128xbf16, #tpu.memory_space<vmem>>, vector<1x16x128xbf16>
    %294 = vector.shape_cast %293 : vector<1x16x128xbf16> to vector<16x128xbf16>
    %295 = arith.extf %294 : vector<16x128xbf16> to vector<16x128xf32>
    %296 = arith.addf %295, %291 : vector<16x128xf32>
    %297 = math.tanh %296 : vector<16x128xf32>
    %298 = arith.truncf %297 : vector<16x128xf32> to vector<16x128xbf16>
    %299 = arith.index_cast %c0_i32_159 : i32 to index
    %c0_163 = arith.constant 0 : index
    %c0_164 = arith.constant 0 : index
    %300 = vector.load %arg20[%299, %c0_163, %c0_164] : memref<8x16x128xbf16, #tpu.memory_space<vmem>>, vector<1x16x128xbf16>
    %301 = vector.shape_cast %300 : vector<1x16x128xbf16> to vector<16x128xbf16>
    %302 = vector.shape_cast %298 : vector<16x128xbf16> to vector<1x16x128xbf16>
    tpu.vector_store %arg20[%299, %c0_163, %c0_164], %302 {strides = array<i32>} : memref<8x16x128xbf16, #tpu.memory_space<vmem>>, vector<1x16x128xbf16>,
    %c1_i32_165 = arith.constant 1 : i32
    %303 = arith.truncf %297 : vector<16x128xf32> to vector<16x128xbf16>
    %cst_166 = arith.constant dense<0.000000e+00> : vector<16x128xf32>
    %304 = tpu.matmul %303, %288, %cst_166 {dimension_numbers = #tpu.dot_dimension_numbers<[1], [0], [0], [1], [0, 0, 1, 1], [], []>} : vector<16x128xbf16>, vector<128x128xbf16>, vector<16x128xf32> -> vector<16x128xf32>
    %305 = arith.index_cast %c1_i32_165 : i32 to index
    %c0_167 = arith.constant 0 : index
    %c0_168 = arith.constant 0 : index
    %306 = vector.load %arg20[%305, %c0_167, %c0_168] : memref<8x16x128xbf16, #tpu.memory_space<vmem>>, vector<1x16x128xbf16>
    %307 = vector.shape_cast %306 : vector<1x16x128xbf16> to vector<16x128xbf16>
    %308 = arith.extf %307 : vector<16x128xbf16> to vector<16x128xf32>
    %309 = arith.addf %308, %304 : vector<16x128xf32>
    %310 = math.tanh %309 : vector<16x128xf32>
    %311 = arith.truncf %310 : vector<16x128xf32> to vector<16x128xbf16>
    %312 = arith.index_cast %c1_i32_165 : i32 to index
    %c0_169 = arith.constant 0 : index
    %c0_170 = arith.constant 0 : index
    %313 = vector.load %arg20[%312, %c0_169, %c0_170] : memref<8x16x128xbf16, #tpu.memory_space<vmem>>, vector<1x16x128xbf16>
    %314 = vector.shape_cast %313 : vector<1x16x128xbf16> to vector<16x128xbf16>
    %315 = vector.shape_cast %311 : vector<16x128xbf16> to vector<1x16x128xbf16>
    tpu.vector_store %arg20[%312, %c0_169, %c0_170], %315 {strides = array<i32>} : memref<8x16x128xbf16, #tpu.memory_space<vmem>>, vector<1x16x128xbf16>,
    %c2_i32_171 = arith.constant 2 : i32
    %316 = arith.truncf %310 : vector<16x128xf32> to vector<16x128xbf16>
    %cst_172 = arith.constant dense<0.000000e+00> : vector<16x128xf32>
    %317 = tpu.matmul %316, %288, %cst_172 {dimension_numbers = #tpu.dot_dimension_numbers<[1], [0], [0], [1], [0, 0, 1, 1], [], []>} : vector<16x128xbf16>, vector<128x128xbf16>, vector<16x128xf32> -> vector<16x128xf32>
    %318 = arith.index_cast %c2_i32_171 : i32 to index
    %c0_173 = arith.constant 0 : index
    %c0_174 = arith.constant 0 : index
    %319 = vector.load %arg20[%318, %c0_173, %c0_174] : memref<8x16x128xbf16, #tpu.memory_space<vmem>>, vector<1x16x128xbf16>
    %320 = vector.shape_cast %319 : vector<1x16x128xbf16> to vector<16x128xbf16>
    %321 = arith.extf %320 : vector<16x128xbf16> to vector<16x128xf32>
    %322 = arith.addf %321, %317 : vector<16x128xf32>
    %323 = math.tanh %322 : vector<16x128xf32>
    %324 = arith.truncf %323 : vector<16x128xf32> to vector<16x128xbf16>
    %325 = arith.index_cast %c2_i32_171 : i32 to index
    %c0_175 = arith.constant 0 : index
    %c0_176 = arith.constant 0 : index
    %326 = vector.load %arg20[%325, %c0_175, %c0_176] : memref<8x16x128xbf16, #tpu.memory_space<vmem>>, vector<1x16x128xbf16>
    %327 = vector.shape_cast %326 : vector<1x16x128xbf16> to vector<16x128xbf16>
    %328 = vector.shape_cast %324 : vector<16x128xbf16> to vector<1x16x128xbf16>
    tpu.vector_store %arg20[%325, %c0_175, %c0_176], %328 {strides = array<i32>} : memref<8x16x128xbf16, #tpu.memory_space<vmem>>, vector<1x16x128xbf16>,
    %c3_i32_177 = arith.constant 3 : i32
    %329 = arith.truncf %323 : vector<16x128xf32> to vector<16x128xbf16>
    %cst_178 = arith.constant dense<0.000000e+00> : vector<16x128xf32>
    %330 = tpu.matmul %329, %288, %cst_178 {dimension_numbers = #tpu.dot_dimension_numbers<[1], [0], [0], [1], [0, 0, 1, 1], [], []>} : vector<16x128xbf16>, vector<128x128xbf16>, vector<16x128xf32> -> vector<16x128xf32>
    %331 = arith.index_cast %c3_i32_177 : i32 to index
    %c0_179 = arith.constant 0 : index
    %c0_180 = arith.constant 0 : index
    %332 = vector.load %arg20[%331, %c0_179, %c0_180] : memref<8x16x128xbf16, #tpu.memory_space<vmem>>, vector<1x16x128xbf16>
    %333 = vector.shape_cast %332 : vector<1x16x128xbf16> to vector<16x128xbf16>
    %334 = arith.extf %333 : vector<16x128xbf16> to vector<16x128xf32>
    %335 = arith.addf %334, %330 : vector<16x128xf32>
    %336 = math.tanh %335 : vector<16x128xf32>
    %337 = arith.truncf %336 : vector<16x128xf32> to vector<16x128xbf16>
    %338 = arith.index_cast %c3_i32_177 : i32 to index
    %c0_181 = arith.constant 0 : index
    %c0_182 = arith.constant 0 : index
    %339 = vector.load %arg20[%338, %c0_181, %c0_182] : memref<8x16x128xbf16, #tpu.memory_space<vmem>>, vector<1x16x128xbf16>
    %340 = vector.shape_cast %339 : vector<1x16x128xbf16> to vector<16x128xbf16>
    %341 = vector.shape_cast %337 : vector<16x128xbf16> to vector<1x16x128xbf16>
    tpu.vector_store %arg20[%338, %c0_181, %c0_182], %341 {strides = array<i32>} : memref<8x16x128xbf16, #tpu.memory_space<vmem>>, vector<1x16x128xbf16>,
    %c4_i32_183 = arith.constant 4 : i32
    %342 = arith.truncf %336 : vector<16x128xf32> to vector<16x128xbf16>
    %cst_184 = arith.constant dense<0.000000e+00> : vector<16x128xf32>
    %343 = tpu.matmul %342, %288, %cst_184 {dimension_numbers = #tpu.dot_dimension_numbers<[1], [0], [0], [1], [0, 0, 1, 1], [], []>} : vector<16x128xbf16>, vector<128x128xbf16>, vector<16x128xf32> -> vector<16x128xf32>
    %344 = arith.index_cast %c4_i32_183 : i32 to index
    %c0_185 = arith.constant 0 : index
    %c0_186 = arith.constant 0 : index
    %345 = vector.load %arg20[%344, %c0_185, %c0_186] : memref<8x16x128xbf16, #tpu.memory_space<vmem>>, vector<1x16x128xbf16>
    %346 = vector.shape_cast %345 : vector<1x16x128xbf16> to vector<16x128xbf16>
    %347 = arith.extf %346 : vector<16x128xbf16> to vector<16x128xf32>
    %348 = arith.addf %347, %343 : vector<16x128xf32>
    %349 = math.tanh %348 : vector<16x128xf32>
    %350 = arith.truncf %349 : vector<16x128xf32> to vector<16x128xbf16>
    %351 = arith.index_cast %c4_i32_183 : i32 to index
    %c0_187 = arith.constant 0 : index
    %c0_188 = arith.constant 0 : index
    %352 = vector.load %arg20[%351, %c0_187, %c0_188] : memref<8x16x128xbf16, #tpu.memory_space<vmem>>, vector<1x16x128xbf16>
    %353 = vector.shape_cast %352 : vector<1x16x128xbf16> to vector<16x128xbf16>
    %354 = vector.shape_cast %350 : vector<16x128xbf16> to vector<1x16x128xbf16>
    tpu.vector_store %arg20[%351, %c0_187, %c0_188], %354 {strides = array<i32>} : memref<8x16x128xbf16, #tpu.memory_space<vmem>>, vector<1x16x128xbf16>,
    %c5_i32_189 = arith.constant 5 : i32
    %355 = arith.truncf %349 : vector<16x128xf32> to vector<16x128xbf16>
    %cst_190 = arith.constant dense<0.000000e+00> : vector<16x128xf32>
    %356 = tpu.matmul %355, %288, %cst_190 {dimension_numbers = #tpu.dot_dimension_numbers<[1], [0], [0], [1], [0, 0, 1, 1], [], []>} : vector<16x128xbf16>, vector<128x128xbf16>, vector<16x128xf32> -> vector<16x128xf32>
    %357 = arith.index_cast %c5_i32_189 : i32 to index
    %c0_191 = arith.constant 0 : index
    %c0_192 = arith.constant 0 : index
    %358 = vector.load %arg20[%357, %c0_191, %c0_192] : memref<8x16x128xbf16, #tpu.memory_space<vmem>>, vector<1x16x128xbf16>
    %359 = vector.shape_cast %358 : vector<1x16x128xbf16> to vector<16x128xbf16>
    %360 = arith.extf %359 : vector<16x128xbf16> to vector<16x128xf32>
    %361 = arith.addf %360, %356 : vector<16x128xf32>
    %362 = math.tanh %361 : vector<16x128xf32>
    %363 = arith.truncf %362 : vector<16x128xf32> to vector<16x128xbf16>
    %364 = arith.index_cast %c5_i32_189 : i32 to index
    %c0_193 = arith.constant 0 : index
    %c0_194 = arith.constant 0 : index
    %365 = vector.load %arg20[%364, %c0_193, %c0_194] : memref<8x16x128xbf16, #tpu.memory_space<vmem>>, vector<1x16x128xbf16>
    %366 = vector.shape_cast %365 : vector<1x16x128xbf16> to vector<16x128xbf16>
    %367 = vector.shape_cast %363 : vector<16x128xbf16> to vector<1x16x128xbf16>
    tpu.vector_store %arg20[%364, %c0_193, %c0_194], %367 {strides = array<i32>} : memref<8x16x128xbf16, #tpu.memory_space<vmem>>, vector<1x16x128xbf16>,
    %c6_i32_195 = arith.constant 6 : i32
    %368 = arith.truncf %362 : vector<16x128xf32> to vector<16x128xbf16>
    %cst_196 = arith.constant dense<0.000000e+00> : vector<16x128xf32>
    %369 = tpu.matmul %368, %288, %cst_196 {dimension_numbers = #tpu.dot_dimension_numbers<[1], [0], [0], [1], [0, 0, 1, 1], [], []>} : vector<16x128xbf16>, vector<128x128xbf16>, vector<16x128xf32> -> vector<16x128xf32>
    %370 = arith.index_cast %c6_i32_195 : i32 to index
    %c0_197 = arith.constant 0 : index
    %c0_198 = arith.constant 0 : index
    %371 = vector.load %arg20[%370, %c0_197, %c0_198] : memref<8x16x128xbf16, #tpu.memory_space<vmem>>, vector<1x16x128xbf16>
    %372 = vector.shape_cast %371 : vector<1x16x128xbf16> to vector<16x128xbf16>
    %373 = arith.extf %372 : vector<16x128xbf16> to vector<16x128xf32>
    %374 = arith.addf %373, %369 : vector<16x128xf32>
    %375 = math.tanh %374 : vector<16x128xf32>
    %376 = arith.truncf %375 : vector<16x128xf32> to vector<16x128xbf16>
    %377 = arith.index_cast %c6_i32_195 : i32 to index
    %c0_199 = arith.constant 0 : index
    %c0_200 = arith.constant 0 : index
    %378 = vector.load %arg20[%377, %c0_199, %c0_200] : memref<8x16x128xbf16, #tpu.memory_space<vmem>>, vector<1x16x128xbf16>
    %379 = vector.shape_cast %378 : vector<1x16x128xbf16> to vector<16x128xbf16>
    %380 = vector.shape_cast %376 : vector<16x128xbf16> to vector<1x16x128xbf16>
    tpu.vector_store %arg20[%377, %c0_199, %c0_200], %380 {strides = array<i32>} : memref<8x16x128xbf16, #tpu.memory_space<vmem>>, vector<1x16x128xbf16>,
    %c7_i32_201 = arith.constant 7 : i32
    %381 = arith.truncf %375 : vector<16x128xf32> to vector<16x128xbf16>
    %cst_202 = arith.constant dense<0.000000e+00> : vector<16x128xf32>
    %382 = tpu.matmul %381, %288, %cst_202 {dimension_numbers = #tpu.dot_dimension_numbers<[1], [0], [0], [1], [0, 0, 1, 1], [], []>} : vector<16x128xbf16>, vector<128x128xbf16>, vector<16x128xf32> -> vector<16x128xf32>
    %383 = arith.index_cast %c7_i32_201 : i32 to index
    %c0_203 = arith.constant 0 : index
    %c0_204 = arith.constant 0 : index
    %384 = vector.load %arg20[%383, %c0_203, %c0_204] : memref<8x16x128xbf16, #tpu.memory_space<vmem>>, vector<1x16x128xbf16>
    %385 = vector.shape_cast %384 : vector<1x16x128xbf16> to vector<16x128xbf16>
    %386 = arith.extf %385 : vector<16x128xbf16> to vector<16x128xf32>
    %387 = arith.addf %386, %382 : vector<16x128xf32>
    %388 = math.tanh %387 : vector<16x128xf32>
    %389 = arith.truncf %388 : vector<16x128xf32> to vector<16x128xbf16>
    %390 = arith.index_cast %c7_i32_201 : i32 to index
    %c0_205 = arith.constant 0 : index
    %c0_206 = arith.constant 0 : index
    %391 = vector.load %arg20[%390, %c0_205, %c0_206] : memref<8x16x128xbf16, #tpu.memory_space<vmem>>, vector<1x16x128xbf16>
    %392 = vector.shape_cast %391 : vector<1x16x128xbf16> to vector<16x128xbf16>
    %393 = vector.shape_cast %389 : vector<16x128xbf16> to vector<1x16x128xbf16>
    tpu.vector_store %arg20[%390, %c0_205, %c0_206], %393 {strides = array<i32>} : memref<8x16x128xbf16, #tpu.memory_space<vmem>>, vector<1x16x128xbf16>,
    %c8_i32_207 = arith.constant 8 : i32
    %c0_208 = arith.constant 0 : index
    %c0_209 = arith.constant 0 : index
    %394 = vector.load %arg16[%c0_208, %c0_209] : memref<128x128xbf16, #tpu.memory_space<vmem>>, vector<128x128xbf16>
    %c0_210 = arith.constant 0 : index
    %c0_211 = arith.constant 0 : index
    %395 = vector.load %arg17[%c0_210, %c0_211] : memref<1x128xf32, #tpu.memory_space<vmem>>, vector<1x128xf32>
    %c0_212 = arith.constant 0 : index
    %c0_213 = arith.constant 0 : index
    %c0_214 = arith.constant 0 : index
    %396 = vector.load %arg20[%c0_212, %c0_213, %c0_214] : memref<8x16x128xbf16, #tpu.memory_space<vmem>>, vector<8x16x128xbf16>
    %397 = vector.shape_cast %396 : vector<8x16x128xbf16> to vector<128x128xbf16>
    %cst_215 = arith.constant dense<0.000000e+00> : vector<128x128xf32>
    %398 = tpu.matmul %397, %394, %cst_215 {dimension_numbers = #tpu.dot_dimension_numbers<[1], [0], [0], [1], [0, 0, 1, 1], [], []>} : vector<128x128xbf16>, vector<128x128xbf16>, vector<128x128xf32> -> vector<128x128xf32>
    %399 = vector.broadcast %395 : vector<1x128xf32> to vector<128x128xf32>
    %400 = arith.addf %398, %399 : vector<128x128xf32>
    %401 = vector.shape_cast %400 : vector<128x128xf32> to vector<8x16x128xf32>
    %c0_216 = arith.constant 0 : index
    %c0_217 = arith.constant 0 : index
    %c0_218 = arith.constant 0 : index
    %402 = vector.load %arg18[%c0_216, %c0_217, %c0_218] : memref<8x16x128xf32, #tpu.memory_space<vmem>>, vector<8x16x128xf32>
    tpu.vector_store %arg18[%c0_216, %c0_217, %c0_218], %401 {strides = array<i32>} : memref<8x16x128xf32, #tpu.memory_space<vmem>>, vector<8x16x128xf32>,
    return
  }
  func.func @transform_0(%arg0: i32) -> (i32, i32, i32) {
    %c0_i32 = arith.constant 0 : i32
    %c0_i32_0 = arith.constant 0 : i32
    %c0_i32_1 = arith.constant 0 : i32
    return %c0_i32, %arg0, %c0_i32_0 : i32, i32, i32
  }
  func.func @transform_1(%arg0: i32) -> (i32, i32) {
    %c0_i32 = arith.constant 0 : i32
    %c0_i32_0 = arith.constant 0 : i32
    %c0_i32_1 = arith.constant 0 : i32
    return %c0_i32, %c0_i32_0 : i32, i32
  }
  func.func @transform_2(%arg0: i32) -> (i32, i32) {
    %c0_i32 = arith.constant 0 : i32
    %c0_i32_0 = arith.constant 0 : i32
    %c0_i32_1 = arith.constant 0 : i32
    return %c0_i32, %c0_i32_0 : i32, i32
  }
  func.func @transform_3(%arg0: i32) -> (i32, i32) {
    %c0_i32 = arith.constant 0 : i32
    %c0_i32_0 = arith.constant 0 : i32
    %c0_i32_1 = arith.constant 0 : i32
    return %c0_i32, %c0_i32_0 : i32, i32
  }
  func.func @transform_4(%arg0: i32) -> (i32, i32) {
    %c0_i32 = arith.constant 0 : i32
    %c0_i32_0 = arith.constant 0 : i32
    %c0_i32_1 = arith.constant 0 : i32
    return %c0_i32, %c0_i32_0 : i32, i32
  }
  func.func @transform_5(%arg0: i32) -> (i32, i32) {
    %c0_i32 = arith.constant 0 : i32
    %c0_i32_0 = arith.constant 0 : i32
    %c0_i32_1 = arith.constant 0 : i32
    return %c0_i32, %c0_i32_0 : i32, i32
  }
  func.func @transform_6(%arg0: i32) -> (i32, i32) {
    %c0_i32 = arith.constant 0 : i32
    %c0_i32_0 = arith.constant 0 : i32
    %c0_i32_1 = arith.constant 0 : i32
    return %c0_i32, %c0_i32_0 : i32, i32
  }
  func.func @transform_7(%arg0: i32) -> (i32, i32) {
    %c0_i32 = arith.constant 0 : i32
    %c0_i32_0 = arith.constant 0 : i32
    %c0_i32_1 = arith.constant 0 : i32
    return %c0_i32, %c0_i32_0 : i32, i32
  }
  func.func @transform_8(%arg0: i32) -> (i32, i32) {
    %c0_i32 = arith.constant 0 : i32
    %c0_i32_0 = arith.constant 0 : i32
    %c0_i32_1 = arith.constant 0 : i32
    return %c0_i32, %c0_i32_0 : i32, i32
  }
  func.func @transform_9(%arg0: i32) -> (i32, i32) {
    %c0_i32 = arith.constant 0 : i32
    %c0_i32_0 = arith.constant 0 : i32
    %c0_i32_1 = arith.constant 0 : i32
    return %c0_i32, %c0_i32_0 : i32, i32
  }
  func.func @transform_10(%arg0: i32) -> (i32, i32) {
    %c0_i32 = arith.constant 0 : i32
    %c0_i32_0 = arith.constant 0 : i32
    %c0_i32_1 = arith.constant 0 : i32
    return %c0_i32, %c0_i32_0 : i32, i32
  }
  func.func @transform_11(%arg0: i32) -> (i32, i32) {
    %c0_i32 = arith.constant 0 : i32
    %c0_i32_0 = arith.constant 0 : i32
    %c0_i32_1 = arith.constant 0 : i32
    return %c0_i32, %c0_i32_0 : i32, i32
  }
  func.func @transform_12(%arg0: i32) -> (i32, i32) {
    %c0_i32 = arith.constant 0 : i32
    %c0_i32_0 = arith.constant 0 : i32
    %c0_i32_1 = arith.constant 0 : i32
    return %c0_i32, %c0_i32_0 : i32, i32
  }
  func.func @transform_13(%arg0: i32) -> (i32, i32) {
    %c0_i32 = arith.constant 0 : i32
    %c0_i32_0 = arith.constant 0 : i32
    %c0_i32_1 = arith.constant 0 : i32
    return %c0_i32, %c0_i32_0 : i32, i32
  }
  func.func @transform_14(%arg0: i32) -> (i32, i32) {
    %c0_i32 = arith.constant 0 : i32
    %c0_i32_0 = arith.constant 0 : i32
    %c0_i32_1 = arith.constant 0 : i32
    return %c0_i32, %c0_i32_0 : i32, i32
  }
  func.func @transform_15(%arg0: i32) -> (i32, i32) {
    %c0_i32 = arith.constant 0 : i32
    %c0_i32_0 = arith.constant 0 : i32
    %c0_i32_1 = arith.constant 0 : i32
    return %c0_i32, %c0_i32_0 : i32, i32
  }
  func.func @transform_16(%arg0: i32) -> (i32, i32) {
    %c0_i32 = arith.constant 0 : i32
    %c0_i32_0 = arith.constant 0 : i32
    %c0_i32_1 = arith.constant 0 : i32
    return %c0_i32, %c0_i32_0 : i32, i32
  }
  func.func @transform_17(%arg0: i32) -> (i32, i32, i32) {
    %c0_i32 = arith.constant 0 : i32
    %c0_i32_0 = arith.constant 0 : i32
    %c0_i32_1 = arith.constant 0 : i32
    return %c0_i32, %arg0, %c0_i32_0 : i32, i32, i32
  }
}

</mosaic_0001>

<bundles_post_ra>
// kernel: sequence_vae_forward.1
= control target key start
LH: loop header
LB: loop body
LE: loop exit
PB: predicated region body
PF: predicated region fallthrough
CT: control target
= control target key end

     0   :  { %v3294_v17 = vmov 0   ;;  %s4151_s1 = inlined_call_operand.vmem [shape: bf16[128,128], index: 1, kind: input, shape index: {}]   ;;  %s4152_s2 = inlined_call_operand.vmem [shape: bf16[128,128], index: 2, kind: input, shape index: {}]   ;;  %s4153_s3 = inlined_call_operand.vmem [shape: f32[1,128], index: 3, kind: input, shape index: {}]   ;;  %s4154_s0 = inlined_call_operand.vmem [shape: bf16[8,16,128], index: 0, kind: input, shape index: {}]   ;;  %s4155_s4 = inlined_call_operand.vmem [shape: bf16[128,128], index: 4, kind: input, shape index: {}]   ;;  %s4156_s6 = inlined_call_operand.vmem [shape: f32[1,128], index: 6, kind: input, shape index: {}]   ;;  %s4157_s5 = inlined_call_operand.vmem [shape: bf16[128,128], index: 5, kind: input, shape index: {}]   ;;  %s4158_s7 = inlined_call_operand.vmem [shape: bf16[128,128], index: 7, kind: input, shape index: {}]   ;;  %s4159_s8 = inlined_call_operand.vmem [shape: f32[1,128], index: 8, kind: input, shape index: {}]   ;;  %s4160_s10 = inlined_call_operand.vmem [shape: bf16[128,128], index: 10, kind: input, shape index: {}]   ;;  %s4161_s9 = inlined_call_operand.vmem [shape: bf16[128,128], index: 9, kind: input, shape index: {}]   ;;  %s4162_s11 = inlined_call_operand.vmem [shape: f32[1,128], index: 11, kind: input, shape index: {}]   ;;  %s4163_s12 = inlined_call_operand.vmem [shape: bf16[128,128], index: 12, kind: input, shape index: {}]   ;;  %s4164_s14 = inlined_call_operand.vmem [shape: f32[1,128], index: 14, kind: input, shape index: {}]   ;;  %s4165_s13 = inlined_call_operand.vmem [shape: bf16[128,128], index: 13, kind: input, shape index: {}]   ;;  %s4166_s15 = inlined_call_operand.vmem [shape: bf16[128,128], index: 15, kind: input, shape index: {}]   ;;  %s4167_s16 = inlined_call_operand.vmem [shape: f32[1,128], index: 16, kind: input, shape index: {}]   ;;  %s4168_s17 = inlined_call_operand.vmem [shape: f32[8,16,128], index: 17, kind: output, shape index: {}]  }
   0x1   :  { %4172 = sst [smem:[#allocation4_spill]] %s4151_s1  ;;  %v2690_v16 = vld [vmem:[%s4154_s0] sm:$0xff]  ;;  %v2691_v18 = vld [vmem:[%s4154_s0 + $0x8] sm:$0xff]  ;;  %v2692_v20 = vld [vmem:[%s4154_s0 + $0x10] sm:$0xff] }
   0x2   :  { %4173 = sst [smem:[#allocation5_spill]] %s4152_s2  ;;  %v3518_v22 = vld [vmem:[%s4153_s3] ss:$0 sm:$0xff]  ;;  %v2693_v32 = vld [vmem:[%s4154_s0 + $0x18] sm:$0xff]  ;;  %v2695_v42 = vld [vmem:[%s4154_s0 + $0x28] sm:$0xff] }
   0x3   :  { %4174 = sst [smem:[#allocation6_spill]] %s4163_s12  ;;  %v2694_v41 = vld [vmem:[%s4154_s0 + $0x20] sm:$0xff]  ;;  %v2696_v43 = vld [vmem:[%s4154_s0 + $0x30] sm:$0xff]  ;;  %v2697_v44 = vld [vmem:[%s4154_s0 + $0x38] sm:$0xff] }
   0x4   :  { %s4175_s26 = sld [smem:[#allocation4_spill]] }
   0x5   :  { %s4176_s12 = sld [smem:[#allocation5_spill]] }
   0x6   :  { %s4177_s0 = sld [smem:[#allocation6_spill]] }
   0xa   :  { %v2689_v0 = vld [vmem:[%s4175_s26 + $0x38] sm:$0xff]  ;;  %v2688_v2 = vld [vmem:[%s4175_s26 + $0x30] sm:$0xff]  ;;  %v2687_v4 = vld [vmem:[%s4175_s26 + $0x28] sm:$0xff] }
   0xb   :  { %v3391_v1 = vld [vmem:[%s4176_s12 + $0x38] sm:$0xff]  ;;  %189 = vmatpush.bf16.msra.mxu0 %v2689_v0  ;;  %v3400_v3 = vld [vmem:[%s4176_s12 + $0x30] sm:$0xff]  ;;  %v3411_v5 = vld [vmem:[%s4176_s12 + $0x28] sm:$0xff] }
   0xc   :  { %334 = vmatpush.bf16.msra.mxu1 %v3391_v1  ;;  %366 = vmatpush.bf16.msra.mxu2 %v3391_v1  ;;  %v2686_v6 = vld [vmem:[%s4175_s26 + $0x20] sm:$0xff]  ;;  %v2685_v8 = vld [vmem:[%s4175_s26 + $0x18] sm:$0xff]  ;;  %v2684_v10 = vld [vmem:[%s4175_s26 + $0x10] sm:$0xff] }
   0xd   :  { %498 = vmatpush.bf16.msra.mxu3 %v3391_v1  ;;  %v3422_v7 = vld [vmem:[%s4176_s12 + $0x20] sm:$0xff]  ;;  %v3433_v9 = vld [vmem:[%s4176_s12 + $0x18] sm:$0xff]  ;;  %v3444_v11 = vld [vmem:[%s4176_s12 + $0x10] sm:$0xff] }
   0xe   :  { %v2683_v12 = vld [vmem:[%s4175_s26 + $0x8] sm:$0xff]  ;;  %v2682_v14 = vld [vmem:[%s4175_s26] sm:$0xff] }
   0xf   :  { %190 = vmatpush.bf16.msra.mxu0 %v2688_v2  ;;  %v3455_v13 = vld [vmem:[%s4176_s12 + $0x8] sm:$0xff]  ;;  %v3466_v15 = vld [vmem:[%s4176_s12] sm:$0xff] }
  0x10   :  { %335 = vmatpush.bf16.msra.mxu1 %v3400_v3  ;;  %367 = vmatpush.bf16.msra.mxu2 %v3400_v3 }
  0x11   :  { %499 = vmatpush.bf16.msra.mxu3 %v3400_v3 }
  0x13   :  { %191 = vmatpush.bf16.msra.mxu0 %v2687_v4 }
  0x14   :  { %336 = vmatpush.bf16.msra.mxu1 %v3411_v5  ;;  %368 = vmatpush.bf16.msra.mxu2 %v3411_v5 }
  0x15   :  { %500 = vmatpush.bf16.msra.mxu3 %v3411_v5 }
  0x17   :  { %192 = vmatpush.bf16.msra.mxu0 %v2686_v6 }
  0x18   :  { %337 = vmatpush.bf16.msra.mxu1 %v3422_v7  ;;  %369 = vmatpush.bf16.msra.mxu2 %v3422_v7 }
  0x19   :  { %501 = vmatpush.bf16.msra.mxu3 %v3422_v7 }
  0x1b   :  { %193 = vmatpush.bf16.msra.mxu0 %v2685_v8 }
  0x1c   :  { %338 = vmatpush.bf16.msra.mxu1 %v3433_v9  ;;  %370 = vmatpush.bf16.msra.mxu2 %v3433_v9 }
  0x1d   :  { %502 = vmatpush.bf16.msra.mxu3 %v3433_v9 }
  0x1f   :  { %194 = vmatpush.bf16.msra.mxu0 %v2684_v10 }
  0x20   :  { %339 = vmatpush.bf16.msra.mxu1 %v3444_v11  ;;  %371 = vmatpush.bf16.msra.mxu2 %v3444_v11 }
  0x21   :  { %503 = vmatpush.bf16.msra.mxu3 %v3444_v11 }
  0x23   :  { %195 = vmatpush.bf16.msra.mxu0 %v2683_v12 }
  0x24   :  { %340 = vmatpush.bf16.msra.mxu1 %v3455_v13  ;;  %372 = vmatpush.bf16.msra.mxu2 %v3455_v13 }
  0x25   :  { %504 = vmatpush.bf16.msra.mxu3 %v3455_v13 }
  0x27   :  { %196 = vmatpush.bf16.msra.mxu0 %v2682_v14 }
  0x28   :  { %341 = vmatpush.bf16.msra.mxu1 %v3466_v15  ;;  %373 = vmatpush.bf16.msra.mxu2 %v3466_v15 }
  0x29   :  { %505 = vmatpush.bf16.msra.mxu3 %v3466_v15 }
  0x2a   :  { %197 = vmatmul.bf16.vlgmr.msra.gmra.mxu0 %v2690_v16 }
  0x2b   :  { %399 = vmatpush.bf16.msrb.mxu0 %v3391_v1  ;;  %342 = vmatmul.bf16.vlgmr.msra.gmra.mxu1 %v3294_v17 }
  0x2c   :  { %432 = vmatpush.bf16.msrb.mxu1 %v3391_v1  ;;  %465 = vmatpush.bf16.msrb.mxu2 %v3391_v1 }
  0x2f   :  { %400 = vmatpush.bf16.msrb.mxu0 %v3400_v3 }
  0x30   :  { %433 = vmatpush.bf16.msrb.mxu1 %v3400_v3  ;;  %466 = vmatpush.bf16.msrb.mxu2 %v3400_v3 }
  0x33   :  { %401 = vmatpush.bf16.msrb.mxu0 %v3411_v5 }
  0x34   :  { %434 = vmatpush.bf16.msrb.mxu1 %v3411_v5  ;;  %467 = vmatpush.bf16.msrb.mxu2 %v3411_v5 }
  0x37   :  { %402 = vmatpush.bf16.msrb.mxu0 %v3422_v7 }
  0x38   :  { %435 = vmatpush.bf16.msrb.mxu1 %v3422_v7  ;;  %468 = vmatpush.bf16.msrb.mxu2 %v3422_v7 }
  0x3a   :  { %202 = vmatmul.bf16.gmra.mxu0 %v2691_v18 }
  0x3b   :  { %403 = vmatpush.bf16.msrb.mxu0 %v3433_v9 }
  0x3c   :  { %436 = vmatpush.bf16.msrb.mxu1 %v3433_v9  ;;  %469 = vmatpush.bf16.msrb.mxu2 %v3433_v9 }
  0x3f   :  { %404 = vmatpush.bf16.msrb.mxu0 %v3444_v11 }
  0x40   :  { %437 = vmatpush.bf16.msrb.mxu1 %v3444_v11  ;;  %470 = vmatpush.bf16.msrb.mxu2 %v3444_v11 }
  0x43   :  { %405 = vmatpush.bf16.msrb.mxu0 %v3455_v13 }
  0x44   :  { %438 = vmatpush.bf16.msrb.mxu1 %v3455_v13  ;;  %471 = vmatpush.bf16.msrb.mxu2 %v3455_v13 }
  0x47   :  { %406 = vmatpush.bf16.msrb.mxu0 %v3466_v15 }
  0x48   :  { %439 = vmatpush.bf16.msrb.mxu1 %v3466_v15  ;;  %472 = vmatpush.bf16.msrb.mxu2 %v3466_v15 }
  0x4a   :  { %207 = vmatmul.bf16.gmra.mxu0 %v2692_v20 }
  0x4c   :  { %531 = vmatpush.bf16.msra.mxu1 %v3391_v1 }
  0x50   :  { %532 = vmatpush.bf16.msra.mxu1 %v3400_v3 }
  0x54   :  { %533 = vmatpush.bf16.msra.mxu1 %v3411_v5 }
  0x58   :  { %534 = vmatpush.bf16.msra.mxu1 %v3422_v7 }
  0x5a   :  { %212 = vmatmul.bf16.gmra.mxu0 %v2693_v32 }
  0x5c   :  { %535 = vmatpush.bf16.msra.mxu1 %v3433_v9 }
  0x60   :  { %536 = vmatpush.bf16.msra.mxu1 %v3444_v11 }
  0x64   :  { %537 = vmatpush.bf16.msra.mxu1 %v3455_v13 }
  0x68   :  { %538 = vmatpush.bf16.msra.mxu1 %v3466_v15 }
  0x6a   :  { %217 = vmatmul.bf16.gmra.mxu0 %v2694_v41 }
  0x7a   :  { %222 = vmatmul.bf16.gmra.mxu0 %v2695_v42 }
  0x8a   :  { %227 = vmatmul.bf16.gmra.mxu0 %v2696_v43 }
  0x9a   :  { %232 = vmatmul.bf16.gmra.mxu0 %v2697_v44 }
  0xa7   :  { %v198_v19 = vpop.f32.mrf.mxu0 }
  0xa8   :  { %v343_v21 = vpop.f32.mrf.mxu1  ;;  %v199_v24 = vadd.f32 %v3518_v22, %v198_v19 }
  0xaf   :  { %v200_v23 = vpop.f32.mrf.mxu0 }
  0xb0   :  { %v201_v25 = vadd.f32 %v3518_v22, %v200_v23  ;;  %v345_v29 = vpop.f32.mrf.mxu1 }
  0xb2   :  { %v2797_v26 = vpack.c.bf16 %v201_v25, %v199_v24 }
  0xb4   :  { %v2836_v27 = vunpack.c.l.bf16 %v2797_v26  ;;  %v2837_v28 = vunpack.c.h.bf16 %v2797_v26 }
  0xb6   :  { %v352_v30 = vadd.f32 %v2836_v27, %v343_v21  ;;  %v353_v31 = vadd.f32 %v2837_v28, %v345_v29 }
  0xb7   :  { %v203_v45 = vpop.f32.mrf.mxu0 }
  0xb8   :  { %3166 = vtanh.f32 %v352_v30  ;;  %v204_v47 = vadd.f32 %v3518_v22, %v203_v45 }
  0xb9   :  { %3168 = vtanh.f32 %v353_v31 }
  0xbe   :  { %v3167_v33 = vpop.eup %3166 }
  0xbf   :  { %v3169_v34 = vpop.eup %3168  ;;  %v356_v35 = vpack.c.bf16 %v3167_v33, %v3167_v33  ;;  %v205_v46 = vpop.f32.mrf.mxu0 }
  0xc0   :  { %v2841_v36 = vpack.c.bf16 %v3169_v34, %v3167_v33  ;;  %v357_v37 = vpack.c.bf16 %v3169_v34, %v3169_v34  ;;  %v206_v48 = vadd.f32 %v3518_v22, %v205_v46 }
  0xc1   :  { %v362_v38 = vunpack.c.l.b16 %v356_v35 }
  0xc2   :  { %2842 = vst [vmem:[#allocation2 + $0x30] sm:$0xff] %v2841_v36   ;;  %v363_v39 = vunpack.c.l.b16 %v357_v37  ;;  %v2802_v50 = vpack.c.bf16 %v206_v48, %v204_v47 }
  0xc4   :  { %v364_v40 = vpack.c.b16 %v363_v39, %v362_v38  ;;  %v2845_v51 = vunpack.c.l.bf16 %v2802_v50  ;;  %v2846_v55 = vunpack.c.h.bf16 %v2802_v50 }
  0xc6   :  { %374 = vmatmul.bf16.vlgmr.msra.gmra.mxu2 %v364_v40 }
  0xc7   :  { %564 = vmatpush.bf16.msra.mxu2 %v3391_v1  ;;  %v208_v49 = vpop.f32.mrf.mxu0 }
  0xc8   :  { %v209_v19 = vadd.f32 %v3518_v22, %v208_v49 }
  0xcb   :  { %565 = vmatpush.bf16.msra.mxu2 %v3400_v3 }
  0xcf   :  { %566 = vmatpush.bf16.msra.mxu2 %v3411_v5  ;;  %v210_v53 = vpop.f32.mrf.mxu0 }
  0xd0   :  { %v211_v20 = vadd.f32 %v3518_v22, %v210_v53 }
  0xd2   :  { %v2807_v21 = vpack.c.bf16 %v211_v20, %v209_v19  ;;  %v2714_v20 = vld [vmem:[#allocation2 + $0x30] sm:$0xff] }
  0xd3   :  { %567 = vmatpush.bf16.msra.mxu2 %v3422_v7 }
  0xd4   :  { %v2854_v24 = vunpack.c.l.bf16 %v2807_v21  ;;  %v2855_v26 = vunpack.c.h.bf16 %v2807_v21 }
  0xd7   :  { %568 = vmatpush.bf16.msra.mxu2 %v3433_v9  ;;  %v213_v57 = vpop.f32.mrf.mxu0 }
  0xd8   :  { %v214_v37 = vadd.f32 %v3518_v22, %v213_v57  ;;  %v2710_v57 = vld [vmem:[%s4155_s4 + $0x20] sm:$0xff] }
  0xdb   :  { %569 = vmatpush.bf16.msra.mxu2 %v3444_v11 }
  0xdf   :  { %570 = vmatpush.bf16.msra.mxu2 %v3455_v13  ;;  %v215_v61 = vpop.f32.mrf.mxu0 }
  0xe0   :  { %v216_v38 = vadd.f32 %v3518_v22, %v215_v61  ;;  %v2708_v61 = vld [vmem:[%s4155_s4 + $0x10] sm:$0xff] }
  0xe2   :  { %v2812_v39 = vpack.c.bf16 %v216_v38, %v214_v37 }
  0xe3   :  { %571 = vmatpush.bf16.msra.mxu2 %v3466_v15 }
  0xe4   :  { %v2863_v41 = vunpack.c.l.bf16 %v2812_v39  ;;  %v2864_v43 = vunpack.c.h.bf16 %v2812_v39 }
  0xe7   :  { %v3547_v4 = vpop.f32.mrf.mxu0 }
  0xef   :  { %v3549_v5 = vpop.f32.mrf.mxu0 }
  0xf7   :  { %v223_v6 = vpop.f32.mrf.mxu0 }
  0xf8   :  { %v224_v7 = vadd.f32 %v3518_v22, %v223_v6 }
  0xff   :  { %v225_v8 = vpop.f32.mrf.mxu0 }
 0x100   :  { %v226_v9 = vadd.f32 %v3518_v22, %v225_v8 }
 0x102   :  { %v3553_v10 = vpack.c.bf16 %v226_v9, %v224_v7 }
 0x104   :  { %v2882_v37 = vunpack.c.h.bf16 %v3553_v10 }
 0x107   :  { %v228_v11 = vpop.f32.mrf.mxu0 }
 0x108   :  { %v229_v12 = vadd.f32 %v3518_v22, %v228_v11 }
 0x10f   :  { %v230_v13 = vpop.f32.mrf.mxu0 }
 0x110   :  { %v231_v14 = vadd.f32 %v3518_v22, %v230_v13 }
 0x112   :  { %v3557_v15 = vpack.c.bf16 %v231_v14, %v229_v12 }
 0x117   :  { %v3559_v16 = vpop.f32.mrf.mxu0 }
 0x11f   :  { %v3561_v18 = vpop.f32.mrf.mxu0 }
 0x149   :  { %v375_v52 = vpop.f32.mrf.mxu2 }
 0x14a   :  { %v385_v54 = vadd.f32 %v2845_v51, %v375_v52 }
 0x14c   :  { %3170 = vtanh.f32 %v385_v54  ;;  %v2713_v54 = vld [vmem:[%s4155_s4 + $0x38] sm:$0xff] }
 0x14d   :  { %723 = vmatpush.bf16.msrb.mxu3 %v2713_v54 }
 0x151   :  { %v377_v56 = vpop.f32.mrf.mxu2 }
 0x152   :  { %v386_v58 = vadd.f32 %v2846_v55, %v377_v56  ;;  %v3171_v59 = vpop.eup %3170  ;;  %v2712_v55 = vld [vmem:[%s4155_s4 + $0x30] sm:$0xff]  ;;  %v2711_v56 = vld [vmem:[%s4155_s4 + $0x28] sm:$0xff] }
 0x153   :  { %v389_v60 = vpack.c.bf16 %v3171_v59, %v3171_v59  ;;  %724 = vmatpush.bf16.msrb.mxu3 %v2712_v55 }
 0x154   :  { %3172 = vtanh.f32 %v386_v58  ;;  %v2709_v58 = vld [vmem:[%s4155_s4 + $0x18] sm:$0xff] }
 0x155   :  { %v395_v1 = vunpack.c.l.b16 %v389_v60  ;;  %v221_v60 = vadd.f32 %v3518_v22, %v3549_v5 }
 0x157   :  { %725 = vmatpush.bf16.msrb.mxu3 %v2711_v56 }
 0x15a   :  { %v3173_v62 = vpop.eup %3172 }
 0x15b   :  { %v2850_v63 = vpack.c.bf16 %v3173_v62, %v3171_v59  ;;  %v390_v0 = vpack.c.bf16 %v3173_v62, %v3173_v62  ;;  %726 = vmatpush.bf16.msrb.mxu3 %v2710_v57  ;;  %v219_v59 = vadd.f32 %v3518_v22, %v3547_v4  ;;  %v3691_v57 = vld [vmem:[%s4156_s6] ss:$0 sm:$0xff] }
 0x15d   :  { %2851 = vst [vmem:[#allocation2] sm:$0xff] %v2850_v63   ;;  %v396_v2 = vunpack.c.l.b16 %v390_v0  ;;  %v2817_v62 = vpack.c.bf16 %v221_v60, %v219_v59  ;;  %v2707_v63 = vld [vmem:[%s4155_s4 + $0x8] sm:$0xff] }
 0x15f   :  { %v397_v3 = vpack.c.b16 %v396_v2, %v395_v1  ;;  %727 = vmatpush.bf16.msrb.mxu3 %v2709_v58  ;;  %v2872_v1 = vunpack.c.l.bf16 %v2817_v62  ;;  %v2706_v2 = vld [vmem:[%s4155_s4] sm:$0xff]  ;;  %v2873_v4 = vunpack.c.h.bf16 %v2817_v62 }
 0x161   :  { %407 = vmatmul.bf16.vlgmr.msrb.gmra.mxu0 %v397_v3 }
 0x163   :  { %728 = vmatpush.bf16.msrb.mxu3 %v2708_v61 }
 0x164   :  { %v2715_v21 = vld [vmem:[#allocation2] sm:$0xff] }
 0x167   :  { %729 = vmatpush.bf16.msrb.mxu3 %v2707_v63 }
 0x16b   :  { %730 = vmatpush.bf16.msrb.mxu3 %v2706_v2 }
 0x1de   :  { %v408_v23 = vpop.f32.mrf.mxu0 }
 0x1df   :  { %v418_v25 = vadd.f32 %v2854_v24, %v408_v23 }
 0x1e1   :  { %3174 = vtanh.f32 %v418_v25 }
 0x1e6   :  { %v410_v27 = vpop.f32.mrf.mxu0 }
 0x1e7   :  { %v419_v28 = vadd.f32 %v2855_v26, %v410_v27  ;;  %v3175_v29 = vpop.eup %3174  ;;  %v3598_v26 = vld [vmem:[%s4157_s5 + $0x38] sm:$0xff]  ;;  %v3606_v27 = vld [vmem:[%s4157_s5 + $0x30] sm:$0xff] }
 0x1e8   :  { %v422_v30 = vpack.c.bf16 %v3175_v29, %v3175_v29  ;;  %915 = vmatpush.bf16.msra.mxu0 %v3598_v26 }
 0x1e9   :  { %3176 = vtanh.f32 %v419_v28  ;;  %v3614_v28 = vld [vmem:[%s4157_s5 + $0x28] sm:$0xff] }
 0x1ea   :  { %v428_v34 = vunpack.c.l.b16 %v422_v30  ;;  %v3630_v30 = vld [vmem:[%s4157_s5 + $0x18] sm:$0xff] }
 0x1ec   :  { %916 = vmatpush.bf16.msra.mxu0 %v3606_v27 }
 0x1ef   :  { %v3177_v31 = vpop.eup %3176 }
 0x1f0   :  { %v2859_v32 = vpack.c.bf16 %v3177_v31, %v3175_v29  ;;  %v423_v33 = vpack.c.bf16 %v3177_v31, %v3177_v31  ;;  %917 = vmatpush.bf16.msra.mxu0 %v3614_v28  ;;  %v3622_v29 = vld [vmem:[%s4157_s5 + $0x20] sm:$0xff]  ;;  %v3638_v31 = vld [vmem:[%s4157_s5 + $0x10] sm:$0xff] }
 0x1f2   :  { %2860 = vst [vmem:[#allocation2 + $0x18] sm:$0xff] %v2859_v32   ;;  %v429_v35 = vunpack.c.l.b16 %v423_v33  ;;  %v3646_v32 = vld [vmem:[%s4157_s5 + $0x8] sm:$0xff] }
 0x1f4   :  { %v430_v36 = vpack.c.b16 %v429_v35, %v428_v34  ;;  %918 = vmatpush.bf16.msra.mxu0 %v3622_v29  ;;  %v2881_v34 = vunpack.c.l.bf16 %v3553_v10  ;;  %v3653_v35 = vld [vmem:[%s4157_s5] sm:$0xff] }
 0x1f6   :  { %440 = vmatmul.bf16.vlgmr.msrb.gmra.mxu1 %v430_v36 }
 0x1f7   :  { %868 = vmatpush.bf16.msrb.mxu1 %v3598_v26 }
 0x1f8   :  { %919 = vmatpush.bf16.msra.mxu0 %v3630_v30 }
 0x1f9   :  { %v2716_v23 = vld [vmem:[#allocation2 + $0x18] sm:$0xff] }
 0x1fb   :  { %869 = vmatpush.bf16.msrb.mxu1 %v3606_v27 }
 0x1fc   :  { %920 = vmatpush.bf16.msra.mxu0 %v3638_v31 }
 0x1ff   :  { %870 = vmatpush.bf16.msrb.mxu1 %v3614_v28 }
 0x200   :  { %921 = vmatpush.bf16.msra.mxu0 %v3646_v32 }
 0x203   :  { %871 = vmatpush.bf16.msrb.mxu1 %v3622_v29 }
 0x204   :  { %922 = vmatpush.bf16.msra.mxu0 %v3653_v35 }
 0x207   :  { %872 = vmatpush.bf16.msrb.mxu1 %v3630_v30 }
 0x208   :  { %987 = vmatpush.bf16.msrb.mxu0 %v3598_v26 }
 0x20b   :  { %873 = vmatpush.bf16.msrb.mxu1 %v3638_v31 }
 0x20c   :  { %988 = vmatpush.bf16.msrb.mxu0 %v3606_v27 }
 0x20f   :  { %874 = vmatpush.bf16.msrb.mxu1 %v3646_v32 }
 0x210   :  { %989 = vmatpush.bf16.msrb.mxu0 %v3614_v28 }
 0x213   :  { %875 = vmatpush.bf16.msrb.mxu1 %v3653_v35 }
 0x214   :  { %990 = vmatpush.bf16.msrb.mxu0 %v3622_v29 }
 0x218   :  { %991 = vmatpush.bf16.msrb.mxu0 %v3630_v30 }
 0x21c   :  { %992 = vmatpush.bf16.msrb.mxu0 %v3638_v31 }
 0x220   :  { %993 = vmatpush.bf16.msrb.mxu0 %v3646_v32 }
 0x224   :  { %994 = vmatpush.bf16.msrb.mxu0 %v3653_v35 }
 0x273   :  { %v441_v40 = vpop.f32.mrf.mxu1 }
 0x274   :  { %v451_v42 = vadd.f32 %v2863_v41, %v441_v40 }
 0x276   :  { %3178 = vtanh.f32 %v451_v42 }
 0x27b   :  { %v443_v44 = vpop.f32.mrf.mxu1 }
 0x27c   :  { %v452_v45 = vadd.f32 %v2864_v43, %v443_v44  ;;  %v3179_v46 = vpop.eup %3178 }
 0x27d   :  { %v455_v47 = vpack.c.bf16 %v3179_v46, %v3179_v46 }
 0x27e   :  { %3180 = vtanh.f32 %v452_v45 }
 0x27f   :  { %v461_v51 = vunpack.c.l.b16 %v455_v47 }
 0x284   :  { %v3181_v48 = vpop.eup %3180 }
 0x285   :  { %v2868_v49 = vpack.c.bf16 %v3181_v48, %v3179_v46  ;;  %v456_v50 = vpack.c.bf16 %v3181_v48, %v3181_v48 }
 0x287   :  { %2869 = vst [vmem:[#allocation2 + $0x10] sm:$0xff] %v2868_v49   ;;  %v462_v52 = vunpack.c.l.b16 %v456_v50  ;;  %v2890_v49 = vunpack.c.l.bf16 %v3557_v15 }
 0x289   :  { %v463_v53 = vpack.c.b16 %v462_v52, %v461_v51  ;;  %v2891_v52 = vunpack.c.h.bf16 %v3557_v15 }
 0x28b   :  { %473 = vmatmul.bf16.vlgmr.msrb.gmra.mxu2 %v463_v53 }
 0x28c   :  { %891 = vmatpush.bf16.msrb.mxu2 %v3598_v26 }
 0x28e   :  { %v2717_v24 = vld [vmem:[#allocation2 + $0x10] sm:$0xff] }
 0x290   :  { %892 = vmatpush.bf16.msrb.mxu2 %v3606_v27 }
 0x294   :  { %893 = vmatpush.bf16.msrb.mxu2 %v3614_v28 }
 0x298   :  { %894 = vmatpush.bf16.msrb.mxu2 %v3622_v29 }
 0x29c   :  { %895 = vmatpush.bf16.msrb.mxu2 %v3630_v30 }
 0x2a0   :  { %896 = vmatpush.bf16.msrb.mxu2 %v3638_v31 }
 0x2a4   :  { %897 = vmatpush.bf16.msrb.mxu2 %v3646_v32 }
 0x2a8   :  { %898 = vmatpush.bf16.msrb.mxu2 %v3653_v35 }
 0x30e   :  { %v474_v0 = vpop.f32.mrf.mxu2 }
 0x30f   :  { %v484_v3 = vadd.f32 %v2872_v1, %v474_v0 }
 0x311   :  { %3182 = vtanh.f32 %v484_v3 }
 0x316   :  { %v476_v5 = vpop.f32.mrf.mxu2 }
 0x317   :  { %v485_v6 = vadd.f32 %v2873_v4, %v476_v5  ;;  %v3183_v7 = vpop.eup %3182 }
 0x318   :  { %v488_v8 = vpack.c.bf16 %v3183_v7, %v3183_v7 }
 0x319   :  { %3184 = vtanh.f32 %v485_v6 }
 0x31a   :  { %v494_v13 = vunpack.c.l.b16 %v488_v8 }
 0x31f   :  { %v3185_v9 = vpop.eup %3184 }
 0x320   :  { %v2877_v11 = vpack.c.bf16 %v3185_v9, %v3183_v7  ;;  %v489_v12 = vpack.c.bf16 %v3185_v9, %v3185_v9 }
 0x322   :  { %2878 = vst [vmem:[#allocation2 + $0x8] sm:$0xff] %v2877_v11   ;;  %v495_v14 = vunpack.c.l.b16 %v489_v12 }
 0x324   :  { %v496_v19 = vpack.c.b16 %v495_v14, %v494_v13  ;;  %v234_v14 = vadd.f32 %v3518_v22, %v3559_v16 }
 0x326   :  { %506 = vmatmul.bf16.vlgmr.msra.gmra.mxu3 %v496_v19  ;;  %v236_v19 = vadd.f32 %v3518_v22, %v3561_v18 }
 0x329   :  { %v2718_v25 = vld [vmem:[#allocation2 + $0x8] sm:$0xff] }
 0x336   :  { %731 = vmatmul.bf16.vlgmr.msrb.gmra.mxu3 %v2714_v20 }
 0x346   :  { %736 = vmatmul.bf16.gmra.mxu3 %v2715_v21  ;;  %v2832_v21 = vpack.c.bf16 %v236_v19, %v234_v14 }
 0x356   :  { %741 = vmatmul.bf16.gmra.mxu3 %v2716_v23 }
 0x366   :  { %746 = vmatmul.bf16.gmra.mxu3 %v2717_v24  ;;  %v2899_v24 = vunpack.c.l.bf16 %v2832_v21 }
 0x376   :  { %751 = vmatmul.bf16.gmra.mxu3 %v2718_v25 }
 0x3a9   :  { %v507_v33 = vpop.f32.mrf.mxu3 }
 0x3aa   :  { %v517_v36 = vadd.f32 %v2881_v34, %v507_v33 }
 0x3ac   :  { %3186 = vtanh.f32 %v517_v36 }
 0x3b1   :  { %v509_v38 = vpop.f32.mrf.mxu3 }
 0x3b2   :  { %v518_v39 = vadd.f32 %v2882_v37, %v509_v38  ;;  %v3187_v40 = vpop.eup %3186 }
 0x3b3   :  { %v521_v41 = vpack.c.bf16 %v3187_v40, %v3187_v40 }
 0x3b4   :  { %3188 = vtanh.f32 %v518_v39 }
 0x3b5   :  { %v527_v45 = vunpack.c.l.b16 %v521_v41 }
 0x3b9   :  { %v732_v50 = vpop.f32.mrf.mxu3 }
 0x3ba   :  { %v3189_v42 = vpop.eup %3188  ;;  %v733_v62 = vadd.f32 %v3691_v57, %v732_v50 }
 0x3bb   :  { %v522_v43 = vpack.c.bf16 %v3189_v42, %v3189_v42  ;;  %v2886_v44 = vpack.c.bf16 %v3189_v42, %v3187_v40 }
 0x3bd   :  { %2887 = vst [vmem:[#allocation2 + $0x20] sm:$0xff] %v2886_v44   ;;  %v528_v46 = vunpack.c.l.b16 %v522_v43 }
 0x3bf   :  { %v529_v10 = vpack.c.b16 %v528_v46, %v527_v45 }
 0x3c1   :  { %539 = vmatmul.bf16.vlgmr.msra.gmra.mxu1 %v529_v10  ;;  %v734_v55 = vpop.f32.mrf.mxu3 }
 0x3c2   :  { %939 = vmatpush.bf16.msra.mxu1 %v3598_v26  ;;  %v735_v58 = vadd.f32 %v3691_v57, %v734_v55 }
 0x3c4   :  { %v2719_v47 = vld [vmem:[#allocation2 + $0x20] sm:$0xff]  ;;  %v2909_v15 = vpack.c.bf16 %v735_v58, %v733_v62 }
 0x3c5   :  { %756 = vmatmul.bf16.gmra.mxu3 %v2719_v47 }
 0x3c6   :  { %940 = vmatpush.bf16.msra.mxu1 %v3606_v27  ;;  %v2949_v4 = vunpack.c.h.bf16 %v2909_v15  ;;  %v2948_v6 = vunpack.c.l.bf16 %v2909_v15 }
 0x3c9   :  { %v737_v20 = vpop.f32.mrf.mxu3 }
 0x3ca   :  { %941 = vmatpush.bf16.msra.mxu1 %v3614_v28 }
 0x3ce   :  { %942 = vmatpush.bf16.msra.mxu1 %v3622_v29 }
 0x3d1   :  { %876 = vmatmul.bf16.vlgmr.msrb.gmra.mxu1 %v3294_v17 }
 0x3d2   :  { %943 = vmatpush.bf16.msra.mxu1 %v3630_v30 }
 0x3d6   :  { %944 = vmatpush.bf16.msra.mxu1 %v3638_v31 }
 0x3da   :  { %945 = vmatpush.bf16.msra.mxu1 %v3646_v32 }
 0x3de   :  { %946 = vmatpush.bf16.msra.mxu1 %v3653_v35 }
 0x3e2   :  { %1011 = vmatpush.bf16.msrb.mxu1 %v3598_v26 }
 0x3e6   :  { %1012 = vmatpush.bf16.msrb.mxu1 %v3606_v27 }
 0x3ea   :  { %1013 = vmatpush.bf16.msrb.mxu1 %v3614_v28 }
 0x3ee   :  { %1014 = vmatpush.bf16.msrb.mxu1 %v3622_v29 }
 0x3f2   :  { %1015 = vmatpush.bf16.msrb.mxu1 %v3630_v30 }
 0x3f6   :  { %1016 = vmatpush.bf16.msrb.mxu1 %v3638_v31 }
 0x3fa   :  { %1017 = vmatpush.bf16.msrb.mxu1 %v3646_v32 }
 0x3fe   :  { %1018 = vmatpush.bf16.msrb.mxu1 %v3653_v35 }
 0x43e   :  { %v540_v48 = vpop.f32.mrf.mxu1 }
 0x43f   :  { %v550_v51 = vadd.f32 %v2890_v49, %v540_v48 }
 0x441   :  { %3190 = vtanh.f32 %v550_v51 }
 0x446   :  { %v542_v53 = vpop.f32.mrf.mxu1 }
 0x447   :  { %v551_v54 = vadd.f32 %v2891_v52, %v542_v53  ;;  %v3191_v56 = vpop.eup %3190 }
 0x448   :  { %v554_v59 = vpack.c.bf16 %v3191_v56, %v3191_v56 }
 0x449   :  { %3192 = vtanh.f32 %v551_v54 }
 0x44a   :  { %v560_v1 = vunpack.c.l.b16 %v554_v59 }
 0x44e   :  { %v877_v60 = vpop.f32.mrf.mxu1 }
 0x44f   :  { %v3193_v61 = vpop.eup %3192  ;;  %v886_v8 = vadd.f32 %v2948_v6, %v877_v60 }
 0x450   :  { %v555_v63 = vpack.c.bf16 %v3193_v61, %v3193_v61  ;;  %v2895_v0 = vpack.c.bf16 %v3193_v61, %v3191_v56 }
 0x452   :  { %2896 = vst [vmem:[#allocation2 + $0x28] sm:$0xff] %v2895_v0   ;;  %v561_v2 = vunpack.c.l.b16 %v555_v63 }
 0x454   :  { %v562_v3 = vpack.c.b16 %v561_v2, %v560_v1 }
 0x456   :  { %572 = vmatmul.bf16.vlgmr.msra.gmra.mxu2 %v562_v3  ;;  %v879_v5 = vpop.f32.mrf.mxu1 }
 0x457   :  { %v887_v7 = vadd.f32 %v2949_v4, %v879_v5  ;;  %963 = vmatpush.bf16.msra.mxu2 %v3598_v26 }
 0x459   :  { %v2720_v9 = vld [vmem:[#allocation2 + $0x28] sm:$0xff]  ;;  %3194 = vtanh.f32 %v887_v7 }
 0x45a   :  { %761 = vmatmul.bf16.gmra.mxu3 %v2720_v9  ;;  %3196 = vtanh.f32 %v886_v8 }
 0x45b   :  { %964 = vmatpush.bf16.msra.mxu2 %v3606_v27 }
 0x45f   :  { %965 = vmatpush.bf16.msra.mxu2 %v3614_v28  ;;  %v3195_v11 = vpop.eup %3194 }
 0x460   :  { %v3197_v12 = vpop.eup %3196 }
 0x461   :  { %v890_v13 = vpack.c.bf16 %v3195_v11, %v3197_v12 }
 0x463   :  { %966 = vmatpush.bf16.msra.mxu2 %v3622_v29 }
 0x466   :  { %899 = vmatmul.bf16.vlgmr.msrb.gmra.mxu2 %v890_v13 }
 0x467   :  { %967 = vmatpush.bf16.msra.mxu2 %v3630_v30 }
 0x46b   :  { %968 = vmatpush.bf16.msra.mxu2 %v3638_v31 }
 0x46f   :  { %969 = vmatpush.bf16.msra.mxu2 %v3646_v32 }
 0x473   :  { %970 = vmatpush.bf16.msra.mxu2 %v3653_v35 }
 0x477   :  { %1035 = vmatpush.bf16.msrb.mxu2 %v3598_v26  ;;  %v2900_v26 = vunpack.c.h.bf16 %v2832_v21 }
 0x47b   :  { %1036 = vmatpush.bf16.msrb.mxu2 %v3606_v27 }
 0x47f   :  { %1037 = vmatpush.bf16.msrb.mxu2 %v3614_v28  ;;  %v739_v28 = vpop.f32.mrf.mxu3 }
 0x483   :  { %1038 = vmatpush.bf16.msrb.mxu2 %v3622_v29 }
 0x487   :  { %1039 = vmatpush.bf16.msrb.mxu2 %v3630_v30  ;;  %v740_v30 = vadd.f32 %v3691_v57, %v739_v28  ;;  %v742_v43 = vpop.f32.mrf.mxu3 }
 0x488   :  { %v743_v46 = vadd.f32 %v3691_v57, %v742_v43 }
 0x48b   :  { %1040 = vmatpush.bf16.msrb.mxu2 %v3638_v31  ;;  %v738_v31 = vadd.f32 %v3691_v57, %v737_v20 }
 0x48d   :  { %v2914_v16 = vpack.c.bf16 %v740_v30, %v738_v31 }
 0x48f   :  { %1041 = vmatpush.bf16.msrb.mxu2 %v3646_v32  ;;  %v2952_v18 = vunpack.c.l.bf16 %v2914_v16  ;;  %v2953_v36 = vunpack.c.h.bf16 %v2914_v16  ;;  %v744_v44 = vpop.f32.mrf.mxu3 }
 0x490   :  { %v745_v45 = vadd.f32 %v3691_v57, %v744_v44 }
 0x492   :  { %v2919_v10 = vpack.c.bf16 %v745_v45, %v743_v46 }
 0x493   :  { %1042 = vmatpush.bf16.msrb.mxu2 %v3653_v35 }
 0x494   :  { %v2956_v48 = vunpack.c.l.bf16 %v2919_v10  ;;  %v2957_v50 = vunpack.c.h.bf16 %v2919_v10 }
 0x497   :  { %v747_v56 = vpop.f32.mrf.mxu3 }
 0x498   :  { %v748_v60 = vadd.f32 %v3691_v57, %v747_v56  ;;  %v2731_v56 = vld [vmem:[%s4158_s7 + $0x8] sm:$0xff] }
 0x49f   :  { %v749_v58 = vpop.f32.mrf.mxu3 }
 0x4a0   :  { %v750_v59 = vadd.f32 %v3691_v57, %v749_v58  ;;  %v2730_v58 = vld [vmem:[%s4158_s7] sm:$0xff] }
 0x4a2   :  { %v2924_v61 = vpack.c.bf16 %v750_v59, %v748_v60  ;;  %v3754_v60 = vld [vmem:[%s4160_s10 + $0x38] sm:$0xff] }
 0x4a3   :  { %1316 = vmatpush.bf16.msra.mxu3 %v3754_v60 }
 0x4a4   :  { %v2960_v63 = vunpack.c.l.bf16 %v2924_v61  ;;  %v2961_v15 = vunpack.c.h.bf16 %v2924_v61  ;;  %v2745_v61 = vld [vmem:[%s4161_s9 + $0x38] sm:$0xff] }
 0x4a7   :  { %v752_v6 = vpop.f32.mrf.mxu3 }
 0x4a8   :  { %v753_v9 = vadd.f32 %v3691_v57, %v752_v6 }
 0x4af   :  { %v754_v7 = vpop.f32.mrf.mxu3 }
 0x4b0   :  { %v755_v8 = vadd.f32 %v3691_v57, %v754_v7 }
 0x4b2   :  { %v2929_v11 = vpack.c.bf16 %v755_v8, %v753_v9  ;;  %v2741_v8 = vld [vmem:[%s4161_s9 + $0x18] sm:$0xff] }
 0x4b4   :  { %v2964_v13 = vunpack.c.l.bf16 %v2929_v11  ;;  %v2965_v19 = vunpack.c.h.bf16 %v2929_v11 }
 0x4d9   :  { %v573_v23 = vpop.f32.mrf.mxu2 }
 0x4da   :  { %v583_v25 = vadd.f32 %v2899_v24, %v573_v23 }
 0x4dc   :  { %3198 = vtanh.f32 %v583_v25 }
 0x4e1   :  { %v575_v27 = vpop.f32.mrf.mxu2 }
 0x4e2   :  { %v584_v29 = vadd.f32 %v2900_v26, %v575_v27  ;;  %v3199_v32 = vpop.eup %3198  ;;  %v757_v26 = vpop.f32.mrf.mxu3 }
 0x4e4   :  { %3200 = vtanh.f32 %v584_v29  ;;  %v758_v29 = vadd.f32 %v3691_v57, %v757_v26  ;;  %v2740_v26 = vld [vmem:[%s4161_s9 + $0x10] sm:$0xff] }
 0x4e9   :  { %v900_v33 = vpop.f32.mrf.mxu2 }
 0x4ea   :  { %v3201_v34 = vpop.eup %3200  ;;  %v910_v35 = vadd.f32 %v2952_v18, %v900_v33  ;;  %v759_v27 = vpop.f32.mrf.mxu3 }
 0x4eb   :  { %v2904_v22 = vpack.c.bf16 %v3201_v34, %v3199_v32  ;;  %v760_v28 = vadd.f32 %v3691_v57, %v759_v27  ;;  %v2739_v27 = vld [vmem:[%s4161_s9 + $0x8] sm:$0xff] }
 0x4ec   :  { %3202 = vtanh.f32 %v910_v35 }
 0x4ed   :  { %2905 = vst [vmem:[#allocation2 + $0x38] sm:$0xff] %v2904_v22   ;;  %v2934_v30 = vpack.c.bf16 %v760_v28, %v758_v29  ;;  %v2738_v28 = vld [vmem:[%s4161_s9] sm:$0xff] }
 0x4ef   :  { %v2968_v32 = vunpack.c.l.bf16 %v2934_v30  ;;  %v2969_v33 = vunpack.c.h.bf16 %v2934_v30  ;;  %v3162_v30 = vld [vmem:[%s4159_s8] ss:$0 sm:$0xff] }
 0x4f1   :  { %v902_v37 = vpop.f32.mrf.mxu2 }
 0x4f2   :  { %v911_v38 = vadd.f32 %v2953_v36, %v902_v37  ;;  %v3203_v40 = vpop.eup %3202  ;;  %v762_v37 = vpop.f32.mrf.mxu3 }
 0x4f3   :  { %v763_v43 = vadd.f32 %v3691_v57, %v762_v37 }
 0x4f4   :  { %3204 = vtanh.f32 %v911_v38  ;;  %v2721_v39 = vld [vmem:[#allocation2 + $0x38] sm:$0xff] }
 0x4f5   :  { %766 = vmatmul.bf16.gmra.mxu3 %v2721_v39  ;;  %v2737_v38 = vld [vmem:[%s4158_s7 + $0x38] sm:$0xff]  ;;  %v2736_v39 = vld [vmem:[%s4158_s7 + $0x30] sm:$0xff] }
 0x4fa   :  { %v3205_v41 = vpop.eup %3204 }
 0x4fb   :  { %v914_v42 = vpack.c.bf16 %v3205_v41, %v3203_v40  ;;  %v764_v40 = vpop.f32.mrf.mxu3  ;;  %v2735_v41 = vld [vmem:[%s4158_s7 + $0x28] sm:$0xff] }
 0x4fd   :  { %923 = vmatmul.bf16.vlgmr.msra.gmra.mxu0 %v914_v42  ;;  %v765_v42 = vadd.f32 %v3691_v57, %v764_v40 }
 0x4fe   :  { %1127 = vmatpush.bf16.msra.mxu0 %v2737_v38 }
 0x4ff   :  { %v2939_v44 = vpack.c.bf16 %v765_v42, %v763_v43 }
 0x501   :  { %v2972_v46 = vunpack.c.l.bf16 %v2939_v44 }
 0x502   :  { %1128 = vmatpush.bf16.msra.mxu0 %v2736_v39 }
 0x506   :  { %1129 = vmatpush.bf16.msra.mxu0 %v2735_v41 }
 0x578   :  { %v767_v59 = vpop.f32.mrf.mxu3 }
 0x57a   :  { %v924_v47 = vpop.f32.mrf.mxu0 }
 0x57b   :  { %v934_v49 = vadd.f32 %v2956_v48, %v924_v47  ;;  %v2973_v47 = vunpack.c.h.bf16 %v2939_v44 }
 0x57d   :  { %3206 = vtanh.f32 %v934_v49 }
 0x582   :  { %v926_v51 = vpop.f32.mrf.mxu0 }
 0x583   :  { %v935_v52 = vadd.f32 %v2957_v50, %v926_v51  ;;  %v3207_v53 = vpop.eup %3206 }
 0x585   :  { %3208 = vtanh.f32 %v935_v52 }
 0x58b   :  { %v3209_v54 = vpop.eup %3208 }
 0x58c   :  { %v938_v55 = vpack.c.bf16 %v3209_v54, %v3207_v53  ;;  %v2734_v53 = vld [vmem:[%s4158_s7 + $0x20] sm:$0xff]  ;;  %v2733_v54 = vld [vmem:[%s4158_s7 + $0x18] sm:$0xff] }
 0x58d   :  { %1130 = vmatpush.bf16.msra.mxu0 %v2734_v53 }
 0x58e   :  { %947 = vmatmul.bf16.vlgmr.msra.gmra.mxu1 %v938_v55  ;;  %v2732_v55 = vld [vmem:[%s4158_s7 + $0x10] sm:$0xff] }
 0x58f   :  { %1210 = vmatpush.bf16.msra.mxu1 %v2745_v61 }
 0x591   :  { %1131 = vmatpush.bf16.msra.mxu0 %v2733_v54 }
 0x595   :  { %1132 = vmatpush.bf16.msra.mxu0 %v2732_v55 }
 0x599   :  { %1133 = vmatpush.bf16.msra.mxu0 %v2731_v56 }
 0x59d   :  { %1134 = vmatpush.bf16.msra.mxu0 %v2730_v58 }
 0x60b   :  { %v948_v62 = vpop.f32.mrf.mxu1 }
 0x60c   :  { %v958_v0 = vadd.f32 %v2960_v63, %v948_v62  ;;  %v3763_v62 = vld [vmem:[%s4160_s10 + $0x30] sm:$0xff] }
 0x60d   :  { %v2744_v63 = vld [vmem:[%s4161_s9 + $0x30] sm:$0xff]  ;;  %1317 = vmatpush.bf16.msra.mxu3 %v3763_v62 }
 0x60e   :  { %3210 = vtanh.f32 %v958_v0  ;;  %v769_v0 = vpop.f32.mrf.mxu3  ;;  %1211 = vmatpush.bf16.msra.mxu1 %v2744_v63 }
 0x613   :  { %v950_v1 = vpop.f32.mrf.mxu1 }
 0x614   :  { %v959_v2 = vadd.f32 %v2961_v15, %v950_v1  ;;  %v3211_v3 = vpop.eup %3210  ;;  %v3774_v15 = vld [vmem:[%s4160_s10 + $0x28] sm:$0xff] }
 0x615   :  { %v2743_v1 = vld [vmem:[%s4161_s9 + $0x28] sm:$0xff]  ;;  %1318 = vmatpush.bf16.msra.mxu3 %v3774_v15 }
 0x616   :  { %3212 = vtanh.f32 %v959_v2  ;;  %v770_v2 = vadd.f32 %v3691_v57, %v769_v0  ;;  %1212 = vmatpush.bf16.msra.mxu1 %v2743_v1 }
 0x61c   :  { %v3213_v4 = vpop.eup %3212 }
 0x61d   :  { %v962_v5 = vpack.c.bf16 %v3213_v4, %v3211_v3  ;;  %v768_v3 = vadd.f32 %v3691_v57, %v767_v59  ;;  %v3787_v4 = vld [vmem:[%s4160_s10 + $0x20] sm:$0xff]  ;;  %v3798_v57 = vld [vmem:[%s4160_s10 + $0x18] sm:$0xff] }
 0x61e   :  { %1319 = vmatpush.bf16.msra.mxu3 %v3787_v4 }
 0x61f   :  { %971 = vmatmul.bf16.vlgmr.msra.gmra.mxu2 %v962_v5  ;;  %v2742_v5 = vld [vmem:[%s4161_s9 + $0x20] sm:$0xff]  ;;  %v2944_v6 = vpack.c.bf16 %v770_v2, %v768_v3 }
 0x620   :  { %1288 = vmatpush.bf16.msra.mxu2 %v3754_v60  ;;  %1213 = vmatpush.bf16.msra.mxu1 %v2742_v5 }
 0x621   :  { %v2976_v9 = vunpack.c.l.bf16 %v2944_v6 }
 0x622   :  { %1320 = vmatpush.bf16.msra.mxu3 %v3798_v57 }
 0x624   :  { %1289 = vmatpush.bf16.msra.mxu2 %v3763_v62  ;;  %1214 = vmatpush.bf16.msra.mxu1 %v2741_v8  ;;  %v2760_v8 = vld [vmem:[%s4177_s0 + $0x30] sm:$0xff] }
 0x628   :  { %1290 = vmatpush.bf16.msra.mxu2 %v3774_v15  ;;  %1215 = vmatpush.bf16.msra.mxu1 %v2740_v26 }
 0x62c   :  { %1291 = vmatpush.bf16.msra.mxu2 %v3787_v4  ;;  %1216 = vmatpush.bf16.msra.mxu1 %v2739_v27 }
 0x630   :  { %1292 = vmatpush.bf16.msra.mxu2 %v3798_v57  ;;  %1217 = vmatpush.bf16.msra.mxu1 %v2738_v28 }
 0x6a2   :  { %v972_v12 = vpop.f32.mrf.mxu2 }
 0x6a3   :  { %v982_v14 = vadd.f32 %v2964_v13, %v972_v12  ;;  %v3809_v12 = vld [vmem:[%s4160_s10 + $0x10] sm:$0xff]  ;;  %v2977_v13 = vunpack.c.h.bf16 %v2944_v6 }
 0x6a4   :  { %1293 = vmatpush.bf16.msra.mxu2 %v3809_v12  ;;  %1321 = vmatpush.bf16.msra.mxu3 %v3809_v12 }
 0x6a5   :  { %3214 = vtanh.f32 %v982_v14 }
 0x6aa   :  { %v974_v20 = vpop.f32.mrf.mxu2 }
 0x6ab   :  { %v983_v21 = vadd.f32 %v2965_v19, %v974_v20  ;;  %v3215_v23 = vpop.eup %3214  ;;  %v3817_v20 = vld [vmem:[%s4160_s10 + $0x8] sm:$0xff] }
 0x6ac   :  { %1294 = vmatpush.bf16.msra.mxu2 %v3817_v20  ;;  %1322 = vmatpush.bf16.msra.mxu3 %v3817_v20 }
 0x6ad   :  { %3216 = vtanh.f32 %v983_v21  ;;  %v3825_v21 = vld [vmem:[%s4160_s10] sm:$0xff] }
 0x6b0   :  { %1295 = vmatpush.bf16.msra.mxu2 %v3825_v21  ;;  %1323 = vmatpush.bf16.msra.mxu3 %v3825_v21 }
 0x6b3   :  { %v3217_v24 = vpop.eup %3216 }
 0x6b4   :  { %v986_v25 = vpack.c.bf16 %v3217_v24, %v3215_v23  ;;  %1428 = vmatpush.bf16.msrb.mxu3 %v3754_v60 }
 0x6b6   :  { %995 = vmatmul.bf16.vlgmr.msrb.gmra.mxu0 %v986_v25 }
 0x6b7   :  { %1344 = vmatpush.bf16.msrb.mxu0 %v3754_v60 }
 0x6b8   :  { %1429 = vmatpush.bf16.msrb.mxu3 %v3763_v62 }
 0x6bb   :  { %1345 = vmatpush.bf16.msrb.mxu0 %v3763_v62 }
 0x6bc   :  { %1430 = vmatpush.bf16.msrb.mxu3 %v3774_v15 }
 0x6bf   :  { %1346 = vmatpush.bf16.msrb.mxu0 %v3774_v15 }
 0x6c0   :  { %1431 = vmatpush.bf16.msrb.mxu3 %v3787_v4 }
 0x6c3   :  { %1347 = vmatpush.bf16.msrb.mxu0 %v3787_v4 }
 0x6c4   :  { %1432 = vmatpush.bf16.msrb.mxu3 %v3798_v57 }
 0x6c7   :  { %1348 = vmatpush.bf16.msrb.mxu0 %v3798_v57 }
 0x6c8   :  { %1433 = vmatpush.bf16.msrb.mxu3 %v3809_v12 }
 0x6cb   :  { %1349 = vmatpush.bf16.msrb.mxu0 %v3809_v12 }
 0x6cc   :  { %1434 = vmatpush.bf16.msrb.mxu3 %v3817_v20 }
 0x6cf   :  { %1350 = vmatpush.bf16.msrb.mxu0 %v3817_v20 }
 0x6d0   :  { %1435 = vmatpush.bf16.msrb.mxu3 %v3825_v21 }
 0x6d3   :  { %1351 = vmatpush.bf16.msrb.mxu0 %v3825_v21 }
 0x733   :  { %v996_v31 = vpop.f32.mrf.mxu0 }
 0x734   :  { %v1006_v16 = vadd.f32 %v2968_v32, %v996_v31 }
 0x736   :  { %3218 = vtanh.f32 %v1006_v16 }
 0x73b   :  { %v998_v34 = vpop.f32.mrf.mxu0 }
 0x73c   :  { %v1007_v22 = vadd.f32 %v2969_v33, %v998_v34  ;;  %v3219_v18 = vpop.eup %3218  ;;  %v3163_v34 = vld [vmem:[%s4162_s11] ss:$0 sm:$0xff] }
 0x73e   :  { %3220 = vtanh.f32 %v1007_v22 }
 0x744   :  { %v3221_v35 = vpop.eup %3220 }
 0x745   :  { %v1010_v36 = vpack.c.bf16 %v3221_v35, %v3219_v18 }
 0x747   :  { %1019 = vmatmul.bf16.vlgmr.msrb.gmra.mxu1 %v1010_v36 }
 0x748   :  { %1372 = vmatpush.bf16.msrb.mxu1 %v3754_v60 }
 0x74c   :  { %1373 = vmatpush.bf16.msrb.mxu1 %v3763_v62 }
 0x750   :  { %1374 = vmatpush.bf16.msrb.mxu1 %v3774_v15 }
 0x754   :  { %1375 = vmatpush.bf16.msrb.mxu1 %v3787_v4 }
 0x758   :  { %1376 = vmatpush.bf16.msrb.mxu1 %v3798_v57 }
 0x75c   :  { %1377 = vmatpush.bf16.msrb.mxu1 %v3809_v12 }
 0x760   :  { %1378 = vmatpush.bf16.msrb.mxu1 %v3817_v20 }
 0x764   :  { %1379 = vmatpush.bf16.msrb.mxu1 %v3825_v21 }
 0x7c4   :  { %v1020_v45 = vpop.f32.mrf.mxu1 }
 0x7c5   :  { %v1030_v10 = vadd.f32 %v2972_v46, %v1020_v45 }
 0x7c7   :  { %3222 = vtanh.f32 %v1030_v10 }
 0x7cc   :  { %v1022_v48 = vpop.f32.mrf.mxu1 }
 0x7cd   :  { %v1031_v49 = vadd.f32 %v2973_v47, %v1022_v48  ;;  %v3223_v50 = vpop.eup %3222 }
 0x7cf   :  { %3224 = vtanh.f32 %v1031_v49 }
 0x7d5   :  { %v3225_v51 = vpop.eup %3224 }
 0x7d6   :  { %v1034_v52 = vpack.c.bf16 %v3225_v51, %v3223_v50 }
 0x7d8   :  { %1043 = vmatmul.bf16.vlgmr.msrb.gmra.mxu2 %v1034_v52 }
 0x7d9   :  { %1400 = vmatpush.bf16.msrb.mxu2 %v3754_v60 }
 0x7dd   :  { %1401 = vmatpush.bf16.msrb.mxu2 %v3763_v62 }
 0x7e1   :  { %1402 = vmatpush.bf16.msrb.mxu2 %v3774_v15 }
 0x7e5   :  { %1403 = vmatpush.bf16.msrb.mxu2 %v3787_v4 }
 0x7e8   :  { %1296 = vmatmul.bf16.vlgmr.msra.gmra.mxu2 %v3294_v17 }
 0x7e9   :  { %1404 = vmatpush.bf16.msrb.mxu2 %v3798_v57 }
 0x7ed   :  { %1405 = vmatpush.bf16.msrb.mxu2 %v3809_v12 }
 0x7f1   :  { %1406 = vmatpush.bf16.msrb.mxu2 %v3817_v20 }
 0x7f5   :  { %1407 = vmatpush.bf16.msrb.mxu2 %v3825_v21 }
 0x85b   :  { %v1044_v7 = vpop.f32.mrf.mxu2 }
 0x85c   :  { %v1054_v11 = vadd.f32 %v2976_v9, %v1044_v7  ;;  %v2759_v9 = vld [vmem:[%s4177_s0 + $0x28] sm:$0xff] }
 0x85e   :  { %3226 = vtanh.f32 %v1054_v11  ;;  %v2758_v11 = vld [vmem:[%s4177_s0 + $0x20] sm:$0xff] }
 0x863   :  { %v1046_v14 = vpop.f32.mrf.mxu2 }
 0x864   :  { %v1055_v19 = vadd.f32 %v2977_v13, %v1046_v14  ;;  %v3227_v23 = vpop.eup %3226  ;;  %v2756_v13 = vld [vmem:[%s4177_s0 + $0x10] sm:$0xff]  ;;  %v2755_v14 = vld [vmem:[%s4177_s0 + $0x8] sm:$0xff] }
 0x866   :  { %3228 = vtanh.f32 %v1055_v19 }
 0x86b   :  { %v1297_v22 = vpop.f32.mrf.mxu2 }
 0x86c   :  { %v3229_v24 = vpop.eup %3228 }
 0x86d   :  { %v1058_v25 = vpack.c.bf16 %v3229_v24, %v3227_v23 }
 0x86f   :  { %1135 = vmatmul.bf16.vlgmr.msra.gmra.mxu0 %v1058_v25 }
 0x870   :  { %1456 = vmatpush.bf16.msra.mxu0 %v3754_v60 }
 0x873   :  { %v1299_v39 = vpop.f32.mrf.mxu2 }
 0x874   :  { %1457 = vmatpush.bf16.msra.mxu0 %v3763_v62 }
 0x878   :  { %1458 = vmatpush.bf16.msra.mxu0 %v3774_v15 }
 0x87c   :  { %1459 = vmatpush.bf16.msra.mxu0 %v3787_v4 }
 0x880   :  { %1460 = vmatpush.bf16.msra.mxu0 %v3798_v57 }
 0x884   :  { %1461 = vmatpush.bf16.msra.mxu0 %v3809_v12 }
 0x888   :  { %1462 = vmatpush.bf16.msra.mxu0 %v3817_v20 }
 0x88c   :  { %1463 = vmatpush.bf16.msra.mxu0 %v3825_v21 }
 0x8ec   :  { %v1136_v29 = vpop.f32.mrf.mxu0 }
 0x8ed   :  { %v1137_v32 = vadd.f32 %v3162_v30, %v1136_v29 }
 0x8f4   :  { %v1138_v31 = vpop.f32.mrf.mxu0 }
 0x8f5   :  { %v1139_v16 = vadd.f32 %v3162_v30, %v1138_v31 }
 0x8f7   :  { %v1141_v33 = vpack.c.bf16 %v1139_v16, %v1137_v32 }
 0x8f9   :  { %1218 = vmatmul.bf16.vlgmr.msra.gmra.mxu1 %v1141_v33 }
 0x8fa   :  { %1484 = vmatpush.bf16.msra.mxu1 %v3754_v60 }
 0x8fe   :  { %1485 = vmatpush.bf16.msra.mxu1 %v3763_v62 }
 0x902   :  { %1486 = vmatpush.bf16.msra.mxu1 %v3774_v15 }
 0x906   :  { %1487 = vmatpush.bf16.msra.mxu1 %v3787_v4 }
 0x90a   :  { %1488 = vmatpush.bf16.msra.mxu1 %v3798_v57  ;;  %v2761_v57 = vld [vmem:[%s4177_s0 + $0x38] sm:$0xff] }
 0x90b   :  { %1638 = vmatpush.bf16.msra.mxu2 %v2761_v57 }
 0x90e   :  { %1489 = vmatpush.bf16.msra.mxu1 %v3809_v12  ;;  %v2757_v12 = vld [vmem:[%s4177_s0 + $0x18] sm:$0xff] }
 0x90f   :  { %1639 = vmatpush.bf16.msra.mxu2 %v2760_v8 }
 0x912   :  { %1490 = vmatpush.bf16.msra.mxu1 %v3817_v20  ;;  %v2754_v20 = vld [vmem:[%s4177_s0] sm:$0xff] }
 0x913   :  { %1640 = vmatpush.bf16.msra.mxu2 %v2759_v9 }
 0x916   :  { %1491 = vmatpush.bf16.msra.mxu1 %v3825_v21 }
 0x917   :  { %1641 = vmatpush.bf16.msra.mxu2 %v2758_v11 }
 0x91b   :  { %1642 = vmatpush.bf16.msra.mxu2 %v2757_v12 }
 0x91f   :  { %1643 = vmatpush.bf16.msra.mxu2 %v2756_v13 }
 0x923   :  { %1644 = vmatpush.bf16.msra.mxu2 %v2755_v14 }
 0x927   :  { %1645 = vmatpush.bf16.msra.mxu2 %v2754_v20 }
 0x976   :  { %v1219_v18 = vpop.f32.mrf.mxu1 }
 0x977   :  { %v3888_v35 = vadd.f32 %v3163_v34, %v1219_v18  ;;  %v3927_v18 = vld [vmem:[%s4165_s13 + $0x38] sm:$0xff] }
 0x979   :  { %v1302_v36 = vadd.f32 %v1297_v22, %v3888_v35 }
 0x97b   :  { %3230 = vtanh.f32 %v1302_v36  ;;  %v3935_v36 = vld [vmem:[%s4165_s13 + $0x30] sm:$0xff] }
 0x97e   :  { %v1221_v37 = vpop.f32.mrf.mxu1 }
 0x97f   :  { %v3891_v38 = vadd.f32 %v3163_v34, %v1221_v37  ;;  %v3943_v37 = vld [vmem:[%s4165_s13 + $0x28] sm:$0xff] }
 0x981   :  { %v1303_v40 = vadd.f32 %v1299_v39, %v3891_v38  ;;  %v3231_v41 = vpop.eup %3230  ;;  %v3951_v39 = vld [vmem:[%s4165_s13 + $0x20] sm:$0xff] }
 0x982   :  { %v1306_v42 = vpack.c.bf16 %v3231_v41, %v3231_v41 }
 0x983   :  { %3232 = vtanh.f32 %v1303_v40  ;;  %v3959_v40 = vld [vmem:[%s4165_s13 + $0x18] sm:$0xff] }
 0x984   :  { %v1312_v46 = vunpack.c.l.b16 %v1306_v42  ;;  %v3975_v42 = vld [vmem:[%s4165_s13 + $0x8] sm:$0xff] }
 0x989   :  { %v3233_v43 = vpop.eup %3232 }
 0x98a   :  { %v1307_v44 = vpack.c.bf16 %v3233_v43, %v3233_v43  ;;  %v2981_v45 = vpack.c.bf16 %v3233_v43, %v3231_v41  ;;  %v3967_v41 = vld [vmem:[%s4165_s13 + $0x10] sm:$0xff] }
 0x98c   :  { %2982 = vst [vmem:[#allocation2 + $0x30] sm:$0xff] %v2981_v45   ;;  %v1313_v10 = vunpack.c.l.b16 %v1307_v44  ;;  %v3981_v44 = vld [vmem:[%s4165_s13] sm:$0xff] }
 0x98e   :  { %v1314_v47 = vpack.c.b16 %v1313_v10, %v1312_v46 }
 0x990   :  { %1324 = vmatmul.bf16.vlgmr.msra.gmra.mxu3 %v1314_v47 }
 0x991   :  { %1783 = vmatpush.bf16.msra.mxu3 %v3927_v18 }
 0x993   :  { %v2762_v16 = vld [vmem:[#allocation2 + $0x30] sm:$0xff] }
 0x995   :  { %1784 = vmatpush.bf16.msra.mxu3 %v3935_v36 }
 0x999   :  { %1785 = vmatpush.bf16.msra.mxu3 %v3943_v37 }
 0x99d   :  { %1786 = vmatpush.bf16.msra.mxu3 %v3951_v39 }
 0x9a1   :  { %1787 = vmatpush.bf16.msra.mxu3 %v3959_v40 }
 0x9a5   :  { %1788 = vmatpush.bf16.msra.mxu3 %v3967_v41 }
 0x9a9   :  { %1789 = vmatpush.bf16.msra.mxu3 %v3975_v42 }
 0x9ad   :  { %1790 = vmatpush.bf16.msra.mxu3 %v3981_v44 }
 0xa13   :  { %v1325_v48 = vpop.f32.mrf.mxu3 }
 0xa14   :  { %v1330_v49 = vadd.f32 %v1325_v48, %v3888_v35 }
 0xa16   :  { %3234 = vtanh.f32 %v1330_v49 }
 0xa1b   :  { %v1327_v50 = vpop.f32.mrf.mxu3 }
 0xa1c   :  { %v1331_v51 = vadd.f32 %v1327_v50, %v3891_v38  ;;  %v3235_v52 = vpop.eup %3234 }
 0xa1d   :  { %v1334_v53 = vpack.c.bf16 %v3235_v52, %v3235_v52 }
 0xa1e   :  { %3236 = vtanh.f32 %v1331_v51 }
 0xa1f   :  { %v1340_v58 = vunpack.c.l.b16 %v1334_v53 }
 0xa24   :  { %v3237_v54 = vpop.eup %3236 }
 0xa25   :  { %v1335_v55 = vpack.c.bf16 %v3237_v54, %v3237_v54  ;;  %v2986_v56 = vpack.c.bf16 %v3237_v54, %v3235_v52 }
 0xa27   :  { %2987 = vst [vmem:[#allocation2] sm:$0xff] %v2986_v56   ;;  %v1341_v59 = vunpack.c.l.b16 %v1335_v55 }
 0xa29   :  { %v1342_v60 = vpack.c.b16 %v1341_v59, %v1340_v58 }
 0xa2b   :  { %1352 = vmatmul.bf16.vlgmr.msrb.gmra.mxu0 %v1342_v60  ;;  %v4011_v60 = vld [vmem:[%s4164_s14] ss:$0 sm:$0xff] }
 0xa2c   :  { %1815 = vmatpush.bf16.msrb.mxu0 %v3927_v18 }
 0xa2e   :  { %v2763_v33 = vld [vmem:[#allocation2] sm:$0xff] }
 0xa30   :  { %1816 = vmatpush.bf16.msrb.mxu0 %v3935_v36 }
 0xa34   :  { %1817 = vmatpush.bf16.msrb.mxu0 %v3943_v37 }
 0xa38   :  { %1818 = vmatpush.bf16.msrb.mxu0 %v3951_v39 }
 0xa3c   :  { %1819 = vmatpush.bf16.msrb.mxu0 %v3959_v40 }
 0xa40   :  { %1820 = vmatpush.bf16.msrb.mxu0 %v3967_v41 }
 0xa44   :  { %1821 = vmatpush.bf16.msrb.mxu0 %v3975_v42 }
 0xa48   :  { %1822 = vmatpush.bf16.msrb.mxu0 %v3981_v44 }
 0xaa8   :  { %v1353_v61 = vpop.f32.mrf.mxu0 }
 0xaa9   :  { %v1358_v62 = vadd.f32 %v1353_v61, %v3888_v35 }
 0xaab   :  { %3238 = vtanh.f32 %v1358_v62 }
 0xab0   :  { %v1355_v63 = vpop.f32.mrf.mxu0 }
 0xab1   :  { %v1359_v0 = vadd.f32 %v1355_v63, %v3891_v38  ;;  %v3239_v15 = vpop.eup %3238 }
 0xab2   :  { %v1362_v1 = vpack.c.bf16 %v3239_v15, %v3239_v15 }
 0xab3   :  { %3240 = vtanh.f32 %v1359_v0 }
 0xab4   :  { %v1368_v5 = vunpack.c.l.b16 %v1362_v1 }
 0xab9   :  { %v3241_v2 = vpop.eup %3240 }
 0xaba   :  { %v1363_v3 = vpack.c.bf16 %v3241_v2, %v3241_v2  ;;  %v2991_v4 = vpack.c.bf16 %v3241_v2, %v3239_v15 }
 0xabc   :  { %2992 = vst [vmem:[#allocation2 + $0x18] sm:$0xff] %v2991_v4   ;;  %v1369_v6 = vunpack.c.l.b16 %v1363_v3 }
 0xabe   :  { %v1370_v7 = vpack.c.b16 %v1369_v6, %v1368_v5 }
 0xac0   :  { %1380 = vmatmul.bf16.vlgmr.msrb.gmra.mxu1 %v1370_v7 }
 0xac1   :  { %1847 = vmatpush.bf16.msrb.mxu1 %v3927_v18 }
 0xac3   :  { %v2764_v34 = vld [vmem:[#allocation2 + $0x18] sm:$0xff] }
 0xac5   :  { %1848 = vmatpush.bf16.msrb.mxu1 %v3935_v36 }
 0xac9   :  { %1849 = vmatpush.bf16.msrb.mxu1 %v3943_v37 }
 0xacd   :  { %1850 = vmatpush.bf16.msrb.mxu1 %v3951_v39 }
 0xad1   :  { %1851 = vmatpush.bf16.msrb.mxu1 %v3959_v40 }
 0xad5   :  { %1852 = vmatpush.bf16.msrb.mxu1 %v3967_v41 }
 0xad9   :  { %1853 = vmatpush.bf16.msrb.mxu1 %v3975_v42 }
 0xadd   :  { %1854 = vmatpush.bf16.msrb.mxu1 %v3981_v44 }
 0xb3d   :  { %v1381_v19 = vpop.f32.mrf.mxu1 }
 0xb3e   :  { %v1386_v21 = vadd.f32 %v1381_v19, %v3888_v35 }
 0xb40   :  { %3242 = vtanh.f32 %v1386_v21 }
 0xb45   :  { %v1383_v23 = vpop.f32.mrf.mxu1 }
 0xb46   :  { %v1387_v24 = vadd.f32 %v1383_v23, %v3891_v38  ;;  %v3243_v25 = vpop.eup %3242 }
 0xb47   :  { %v1390_v26 = vpack.c.bf16 %v3243_v25, %v3243_v25 }
 0xb48   :  { %3244 = vtanh.f32 %v1387_v24 }
 0xb49   :  { %v1396_v30 = vunpack.c.l.b16 %v1390_v26 }
 0xb4e   :  { %v3245_v27 = vpop.eup %3244 }
 0xb4f   :  { %v1391_v28 = vpack.c.bf16 %v3245_v27, %v3245_v27  ;;  %v2996_v29 = vpack.c.bf16 %v3245_v27, %v3243_v25 }
 0xb51   :  { %2997 = vst [vmem:[#allocation2 + $0x10] sm:$0xff] %v2996_v29   ;;  %v1397_v31 = vunpack.c.l.b16 %v1391_v28 }
 0xb53   :  { %v1398_v32 = vpack.c.b16 %v1397_v31, %v1396_v30 }
 0xb55   :  { %1408 = vmatmul.bf16.vlgmr.msrb.gmra.mxu2 %v1398_v32 }
 0xb58   :  { %v2765_v22 = vld [vmem:[#allocation2 + $0x10] sm:$0xff] }
 0xb65   :  { %1646 = vmatmul.bf16.vlgmr.msra.gmra.mxu2 %v2762_v16 }
 0xb75   :  { %1651 = vmatmul.bf16.gmra.mxu2 %v2763_v33 }
 0xb85   :  { %1656 = vmatmul.bf16.gmra.mxu2 %v2764_v34 }
 0xb95   :  { %1661 = vmatmul.bf16.gmra.mxu2 %v2765_v22 }
 0xbd8   :  { %v1409_v43 = vpop.f32.mrf.mxu2 }
 0xbd9   :  { %v1414_v45 = vadd.f32 %v1409_v43, %v3888_v35 }
 0xbdb   :  { %3246 = vtanh.f32 %v1414_v45 }
 0xbe0   :  { %v1411_v46 = vpop.f32.mrf.mxu2 }
 0xbe1   :  { %v1415_v10 = vadd.f32 %v1411_v46, %v3891_v38  ;;  %v3247_v47 = vpop.eup %3246 }
 0xbe2   :  { %v1418_v48 = vpack.c.bf16 %v3247_v47, %v3247_v47 }
 0xbe3   :  { %3248 = vtanh.f32 %v1415_v10 }
 0xbe4   :  { %v1424_v52 = vunpack.c.l.b16 %v1418_v48 }
 0xbe9   :  { %v3249_v49 = vpop.eup %3248 }
 0xbea   :  { %v1419_v50 = vpack.c.bf16 %v3249_v49, %v3249_v49  ;;  %v3001_v51 = vpack.c.bf16 %v3249_v49, %v3247_v47 }
 0xbec   :  { %3002 = vst [vmem:[#allocation2 + $0x8] sm:$0xff] %v3001_v51   ;;  %v1425_v53 = vunpack.c.l.b16 %v1419_v50 }
 0xbee   :  { %v1426_v54 = vpack.c.b16 %v1425_v53, %v1424_v52 }
 0xbf0   :  { %1436 = vmatmul.bf16.vlgmr.msrb.gmra.mxu3 %v1426_v54 }
 0xbf1   :  { %1879 = vmatpush.bf16.msrb.mxu3 %v3927_v18 }
 0xbf3   :  { %v2766_v55 = vld [vmem:[#allocation2 + $0x8] sm:$0xff] }
 0xbf4   :  { %1666 = vmatmul.bf16.gmra.mxu2 %v2766_v55 }
 0xbf5   :  { %1880 = vmatpush.bf16.msrb.mxu3 %v3935_v36 }
 0xbf9   :  { %1881 = vmatpush.bf16.msrb.mxu3 %v3943_v37 }
 0xbfd   :  { %1882 = vmatpush.bf16.msrb.mxu3 %v3951_v39 }
 0xc00   :  { %1791 = vmatmul.bf16.vlgmr.msra.gmra.mxu3 %v3294_v17  ;;  %v1647_v17 = vpop.f32.mrf.mxu2 }
 0xc01   :  { %1883 = vmatpush.bf16.msrb.mxu3 %v3959_v40  ;;  %v1648_v0 = vadd.f32 %v4011_v60, %v1647_v17 }
 0xc05   :  { %1884 = vmatpush.bf16.msrb.mxu3 %v3967_v41 }
 0xc08   :  { %v1649_v59 = vpop.f32.mrf.mxu2 }
 0xc09   :  { %1885 = vmatpush.bf16.msrb.mxu3 %v3975_v42  ;;  %v1650_v62 = vadd.f32 %v4011_v60, %v1649_v59 }
 0xc0b   :  { %v3021_v1 = vpack.c.bf16 %v1650_v62, %v1648_v0 }
 0xc0d   :  { %1886 = vmatpush.bf16.msrb.mxu3 %v3981_v44  ;;  %v3060_v5 = vunpack.c.l.bf16 %v3021_v1  ;;  %v3061_v12 = vunpack.c.h.bf16 %v3021_v1 }
 0xc10   :  { %v1652_v29 = vpop.f32.mrf.mxu2 }
 0xc11   :  { %1975 = vmatpush.bf16.msra.mxu3 %v3927_v18  ;;  %v1653_v22 = vadd.f32 %v4011_v60, %v1652_v29 }
 0xc15   :  { %1976 = vmatpush.bf16.msra.mxu3 %v3935_v36 }
 0xc18   :  { %v1654_v32 = vpop.f32.mrf.mxu2 }
 0xc19   :  { %1977 = vmatpush.bf16.msra.mxu3 %v3943_v37  ;;  %v1655_v33 = vadd.f32 %v4011_v60, %v1654_v32 }
 0xc1b   :  { %v3026_v45 = vpack.c.bf16 %v1655_v33, %v1653_v22 }
 0xc1d   :  { %1978 = vmatpush.bf16.msra.mxu3 %v3951_v39  ;;  %v3069_v48 = vunpack.c.l.bf16 %v3026_v45  ;;  %v3070_v55 = vunpack.c.h.bf16 %v3026_v45 }
 0xc21   :  { %1979 = vmatpush.bf16.msra.mxu3 %v3959_v40 }
 0xc25   :  { %1980 = vmatpush.bf16.msra.mxu3 %v3967_v41 }
 0xc29   :  { %1981 = vmatpush.bf16.msra.mxu3 %v3975_v42 }
 0xc2d   :  { %1982 = vmatpush.bf16.msra.mxu3 %v3981_v44 }
 0xc73   :  { %v1437_v56 = vpop.f32.mrf.mxu3 }
 0xc74   :  { %v1442_v58 = vadd.f32 %v1437_v56, %v3888_v35 }
 0xc76   :  { %3250 = vtanh.f32 %v1442_v58 }
 0xc7b   :  { %v1439_v61 = vpop.f32.mrf.mxu3 }
 0xc7c   :  { %v1443_v63 = vadd.f32 %v1439_v61, %v3891_v38  ;;  %v3251_v15 = vpop.eup %3250 }
 0xc7d   :  { %v1446_v2 = vpack.c.bf16 %v3251_v15, %v3251_v15 }
 0xc7e   :  { %3252 = vtanh.f32 %v1443_v63 }
 0xc7f   :  { %v1452_v8 = vunpack.c.l.b16 %v1446_v2 }
 0xc83   :  { %v1792_v3 = vpop.f32.mrf.mxu3 }
 0xc84   :  { %v3253_v4 = vpop.eup %3252  ;;  %v1801_v57 = vadd.f32 %v3060_v5, %v1792_v3 }
 0xc85   :  { %v1447_v6 = vpack.c.bf16 %v3253_v4, %v3253_v4  ;;  %v3006_v7 = vpack.c.bf16 %v3253_v4, %v3251_v15 }
 0xc86   :  { %3254 = vtanh.f32 %v1801_v57 }
 0xc87   :  { %3007 = vst [vmem:[#allocation2 + $0x20] sm:$0xff] %v3006_v7   ;;  %v1453_v9 = vunpack.c.l.b16 %v1447_v6 }
 0xc89   :  { %v1454_v11 = vpack.c.b16 %v1453_v9, %v1452_v8 }
 0xc8b   :  { %1464 = vmatmul.bf16.vlgmr.msra.gmra.mxu0 %v1454_v11  ;;  %v1794_v13 = vpop.f32.mrf.mxu3 }
 0xc8c   :  { %v1802_v14 = vadd.f32 %v3061_v12, %v1794_v13  ;;  %1911 = vmatpush.bf16.msra.mxu0 %v3927_v18  ;;  %v3255_v20 = vpop.eup %3254 }
 0xc8d   :  { %v1805_v21 = vpack.c.bf16 %v3255_v20, %v3255_v20 }
 0xc8e   :  { %3256 = vtanh.f32 %v1802_v14  ;;  %v2767_v19 = vld [vmem:[#allocation2 + $0x20] sm:$0xff] }
 0xc8f   :  { %1671 = vmatmul.bf16.gmra.mxu2 %v2767_v19  ;;  %v1811_v26 = vunpack.c.l.b16 %v1805_v21 }
 0xc90   :  { %1912 = vmatpush.bf16.msra.mxu0 %v3935_v36 }
 0xc94   :  { %v3257_v23 = vpop.eup %3256  ;;  %1913 = vmatpush.bf16.msra.mxu0 %v3943_v37 }
 0xc95   :  { %v1806_v24 = vpack.c.bf16 %v3257_v23, %v3257_v23  ;;  %v3065_v25 = vpack.c.bf16 %v3257_v23, %v3255_v20 }
 0xc97   :  { %3066 = vst [vmem:[#allocation3] sm:$0xff] %v3065_v25   ;;  %v1812_v27 = vunpack.c.l.b16 %v1806_v24 }
 0xc98   :  { %1914 = vmatpush.bf16.msra.mxu0 %v3951_v39 }
 0xc99   :  { %v1813_v28 = vpack.c.b16 %v1812_v27, %v1811_v26 }
 0xc9b   :  { %1823 = vmatmul.bf16.vlgmr.msrb.gmra.mxu0 %v1813_v28 }
 0xc9c   :  { %1915 = vmatpush.bf16.msra.mxu0 %v3959_v40 }
 0xca0   :  { %1916 = vmatpush.bf16.msra.mxu0 %v3967_v41 }
 0xca4   :  { %1917 = vmatpush.bf16.msra.mxu0 %v3975_v42 }
 0xca8   :  { %1918 = vmatpush.bf16.msra.mxu0 %v3981_v44 }
 0xcac   :  { %2007 = vmatpush.bf16.msrb.mxu0 %v3927_v18 }
 0xcb0   :  { %2008 = vmatpush.bf16.msrb.mxu0 %v3935_v36 }
 0xcb4   :  { %2009 = vmatpush.bf16.msrb.mxu0 %v3943_v37 }
 0xcb8   :  { %2010 = vmatpush.bf16.msrb.mxu0 %v3951_v39 }
 0xcbc   :  { %2011 = vmatpush.bf16.msrb.mxu0 %v3959_v40 }
 0xcc0   :  { %2012 = vmatpush.bf16.msrb.mxu0 %v3967_v41 }
 0xcc4   :  { %2013 = vmatpush.bf16.msrb.mxu0 %v3975_v42 }
 0xcc8   :  { %2014 = vmatpush.bf16.msrb.mxu0 %v3981_v44 }
 0xd08   :  { %v1465_v30 = vpop.f32.mrf.mxu0 }
 0xd09   :  { %v1470_v31 = vadd.f32 %v1465_v30, %v3888_v35 }
 0xd0b   :  { %3258 = vtanh.f32 %v1470_v31 }
 0xd10   :  { %v1467_v16 = vpop.f32.mrf.mxu0 }
 0xd11   :  { %v1471_v34 = vadd.f32 %v1467_v16, %v3891_v38  ;;  %v3259_v43 = vpop.eup %3258 }
 0xd12   :  { %v1474_v46 = vpack.c.bf16 %v3259_v43, %v3259_v43 }
 0xd13   :  { %3260 = vtanh.f32 %v1471_v34 }
 0xd14   :  { %v1480_v52 = vunpack.c.l.b16 %v1474_v46 }
 0xd18   :  { %v1824_v10 = vpop.f32.mrf.mxu0 }
 0xd19   :  { %v3261_v47 = vpop.eup %3260  ;;  %v1833_v51 = vadd.f32 %v3069_v48, %v1824_v10 }
 0xd1a   :  { %v1475_v49 = vpack.c.bf16 %v3261_v47, %v3261_v47  ;;  %v3011_v50 = vpack.c.bf16 %v3261_v47, %v3259_v43 }
 0xd1b   :  { %3262 = vtanh.f32 %v1833_v51  ;;  %v2784_v51 = vld [vmem:[%s4166_s15 + $0x30] sm:$0xff] }
 0xd1c   :  { %3012 = vst [vmem:[#allocation2 + $0x28] sm:$0xff] %v3011_v50   ;;  %v1481_v53 = vunpack.c.l.b16 %v1475_v49  ;;  %v2785_v50 = vld [vmem:[%s4166_s15 + $0x38] sm:$0xff] }
 0xd1e   :  { %v1482_v54 = vpack.c.b16 %v1481_v53, %v1480_v52  ;;  %v2783_v53 = vld [vmem:[%s4166_s15 + $0x28] sm:$0xff] }
 0xd20   :  { %1492 = vmatmul.bf16.vlgmr.msra.gmra.mxu1 %v1482_v54  ;;  %v1826_v17 = vpop.f32.mrf.mxu0  ;;  %v2782_v54 = vld [vmem:[%s4166_s15 + $0x20] sm:$0xff] }
 0xd21   :  { %v1834_v56 = vadd.f32 %v3070_v55, %v1826_v17  ;;  %1943 = vmatpush.bf16.msra.mxu1 %v3927_v18  ;;  %v3263_v59 = vpop.eup %3262  ;;  %v1657_v18 = vpop.f32.mrf.mxu2  ;;  %v2781_v17 = vld [vmem:[%s4166_s15 + $0x18] sm:$0xff] }
 0xd22   :  { %v1837_v61 = vpack.c.bf16 %v3263_v59, %v3263_v59  ;;  %v1658_v6 = vadd.f32 %v4011_v60, %v1657_v18 }
 0xd23   :  { %3264 = vtanh.f32 %v1834_v56  ;;  %v2768_v58 = vld [vmem:[#allocation2 + $0x28] sm:$0xff] }
 0xd24   :  { %1676 = vmatmul.bf16.gmra.mxu2 %v2768_v58  ;;  %v1843_v15 = vunpack.c.l.b16 %v1837_v61  ;;  %v2780_v58 = vld [vmem:[%s4166_s15 + $0x10] sm:$0xff] }
 0xd25   :  { %1944 = vmatpush.bf16.msra.mxu1 %v3935_v36 }
 0xd29   :  { %v3265_v62 = vpop.eup %3264  ;;  %1945 = vmatpush.bf16.msra.mxu1 %v3943_v37  ;;  %v1659_v37 = vpop.f32.mrf.mxu2 }
 0xd2a   :  { %v1838_v63 = vpack.c.bf16 %v3265_v62, %v3265_v62  ;;  %v3074_v0 = vpack.c.bf16 %v3265_v62, %v3263_v59  ;;  %v1660_v5 = vadd.f32 %v4011_v60, %v1659_v37  ;;  %v2779_v62 = vld [vmem:[%s4166_s15 + $0x8] sm:$0xff] }
 0xd2c   :  { %3075 = vst [vmem:[#allocation3 + $0x18] sm:$0xff] %v3074_v0   ;;  %v1844_v1 = vunpack.c.l.b16 %v1838_v63 }
 0xd2d   :  { %1946 = vmatpush.bf16.msra.mxu1 %v3951_v39 }
 0xd2e   :  { %v1845_v2 = vpack.c.b16 %v1844_v1, %v1843_v15  ;;  %v2778_v15 = vld [vmem:[%s4166_s15] sm:$0xff] }
 0xd30   :  { %1855 = vmatmul.bf16.vlgmr.msrb.gmra.mxu1 %v1845_v2 }
 0xd31   :  { %1947 = vmatpush.bf16.msra.mxu1 %v3959_v40  ;;  %v3031_v40 = vpack.c.bf16 %v1660_v5, %v1658_v6  ;;  %v1662_v25 = vpop.f32.mrf.mxu2 }
 0xd32   :  { %v1663_v28 = vadd.f32 %v4011_v60, %v1662_v25 }
 0xd33   :  { %v3078_v57 = vunpack.c.l.bf16 %v3031_v40  ;;  %v3079_v9 = vunpack.c.h.bf16 %v3031_v40 }
 0xd35   :  { %1948 = vmatpush.bf16.msra.mxu1 %v3967_v41 }
 0xd39   :  { %1949 = vmatpush.bf16.msra.mxu1 %v3975_v42  ;;  %v1664_v26 = vpop.f32.mrf.mxu2 }
 0xd3a   :  { %v1665_v27 = vadd.f32 %v4011_v60, %v1664_v26 }
 0xd3c   :  { %v3036_v29 = vpack.c.bf16 %v1665_v27, %v1663_v28 }
 0xd3d   :  { %1950 = vmatpush.bf16.msra.mxu1 %v3981_v44 }
 0xd3e   :  { %v3087_v31 = vunpack.c.l.bf16 %v3036_v29  ;;  %v3088_v16 = vunpack.c.h.bf16 %v3036_v29 }
 0xd41   :  { %2165 = vmatpush.bf16.msrb.mxu1 %v2785_v50  ;;  %v1667_v52 = vpop.f32.mrf.mxu2 }
 0xd42   :  { %v1668_v59 = vadd.f32 %v4011_v60, %v1667_v52 }
 0xd45   :  { %2166 = vmatpush.bf16.msrb.mxu1 %v2784_v51 }
 0xd49   :  { %2167 = vmatpush.bf16.msrb.mxu1 %v2783_v53  ;;  %v1669_v55 = vpop.f32.mrf.mxu2 }
 0xd4a   :  { %v1670_v56 = vadd.f32 %v4011_v60, %v1669_v55 }
 0xd4c   :  { %v3041_v61 = vpack.c.bf16 %v1670_v56, %v1668_v59 }
 0xd4d   :  { %2168 = vmatpush.bf16.msrb.mxu1 %v2782_v54 }
 0xd4e   :  { %v3096_v0 = vunpack.c.l.bf16 %v3041_v61  ;;  %v3097_v2 = vunpack.c.h.bf16 %v3041_v61 }
 0xd51   :  { %2169 = vmatpush.bf16.msrb.mxu1 %v2781_v17 }
 0xd55   :  { %2170 = vmatpush.bf16.msrb.mxu1 %v2780_v58 }
 0xd59   :  { %2171 = vmatpush.bf16.msrb.mxu1 %v2779_v62 }
 0xd5d   :  { %2172 = vmatpush.bf16.msrb.mxu1 %v2778_v15 }
 0xd9d   :  { %v1493_v36 = vpop.f32.mrf.mxu1 }
 0xd9e   :  { %v1498_v3 = vadd.f32 %v1493_v36, %v3888_v35 }
 0xda0   :  { %3266 = vtanh.f32 %v1498_v3 }
 0xda5   :  { %v1495_v4 = vpop.f32.mrf.mxu1 }
 0xda6   :  { %v1499_v39 = vadd.f32 %v1495_v4, %v3891_v38  ;;  %v3267_v41 = vpop.eup %3266 }
 0xda8   :  { %3268 = vtanh.f32 %v1499_v39 }
 0xdad   :  { %v1856_v7 = vpop.f32.mrf.mxu1 }
 0xdae   :  { %v3269_v42 = vpop.eup %3268  ;;  %v1865_v8 = vadd.f32 %v3078_v57, %v1856_v7  ;;  %v2786_v7 = vld [vmem:[#allocation3] sm:$0xff] }
 0xdaf   :  { %v3016_v44 = vpack.c.bf16 %v3269_v42, %v3267_v41  ;;  %v2787_v42 = vld [vmem:[#allocation3 + $0x18] sm:$0xff] }
 0xdb0   :  { %3270 = vtanh.f32 %v1865_v8 }
 0xdb1   :  { %3017 = vst [vmem:[#allocation2 + $0x38] sm:$0xff] %v3016_v44   ;;  %v1672_v44 = vpop.f32.mrf.mxu2 }
 0xdb5   :  { %v1858_v35 = vpop.f32.mrf.mxu1 }
 0xdb6   :  { %v1866_v11 = vadd.f32 %v3079_v9, %v1858_v35  ;;  %v3271_v13 = vpop.eup %3270  ;;  %v1673_v35 = vadd.f32 %v4011_v60, %v1672_v44 }
 0xdb7   :  { %v1869_v38 = vpack.c.bf16 %v3271_v13, %v3271_v13 }
 0xdb8   :  { %3272 = vtanh.f32 %v1866_v11  ;;  %v2769_v12 = vld [vmem:[#allocation2 + $0x38] sm:$0xff] }
 0xdb9   :  { %1681 = vmatmul.bf16.gmra.mxu2 %v2769_v12  ;;  %v1875_v21 = vunpack.c.l.b16 %v1869_v38  ;;  %v1674_v8 = vpop.f32.mrf.mxu2 }
 0xdba   :  { %v1675_v9 = vadd.f32 %v4011_v60, %v1674_v8 }
 0xdbc   :  { %v3046_v11 = vpack.c.bf16 %v1675_v9, %v1673_v35 }
 0xdbe   :  { %v3273_v14 = vpop.eup %3272 }
 0xdbf   :  { %v1870_v19 = vpack.c.bf16 %v3273_v14, %v3273_v14  ;;  %v3083_v20 = vpack.c.bf16 %v3273_v14, %v3271_v13  ;;  %v3105_v13 = vunpack.c.l.bf16 %v3046_v11  ;;  %v3106_v14 = vunpack.c.h.bf16 %v3046_v11 }
 0xdc1   :  { %3084 = vst [vmem:[#allocation3 + $0x10] sm:$0xff] %v3083_v20   ;;  %v1876_v23 = vunpack.c.l.b16 %v1870_v19  ;;  %v1677_v52 = vpop.f32.mrf.mxu2 }
 0xdc2   :  { %v1678_v55 = vadd.f32 %v4011_v60, %v1677_v52 }
 0xdc3   :  { %v1877_v24 = vpack.c.b16 %v1876_v23, %v1875_v21  ;;  %v4081_v23 = vld [vmem:[%s4167_s16] ss:$0 sm:$0xff] }
 0xdc5   :  { %1887 = vmatmul.bf16.vlgmr.msrb.gmra.mxu3 %v1877_v24 }
 0xdc6   :  { %3151 = vmatpush.bf16.msrb.mxu3 %v2785_v50 }
 0xdc8   :  { %v2788_v57 = vld [vmem:[#allocation3 + $0x10] sm:$0xff] }
 0xdca   :  { %3152 = vmatpush.bf16.msrb.mxu3 %v2784_v51 }
 0xdce   :  { %3153 = vmatpush.bf16.msrb.mxu3 %v2783_v53  ;;  %v1679_v53 = vpop.f32.mrf.mxu2 }
 0xdd2   :  { %3154 = vmatpush.bf16.msrb.mxu3 %v2782_v54  ;;  %v1680_v54 = vadd.f32 %v4011_v60, %v1679_v53 }
 0xdd6   :  { %3155 = vmatpush.bf16.msrb.mxu3 %v2781_v17  ;;  %v3051_v17 = vpack.c.bf16 %v1680_v54, %v1678_v55 }
 0xdd8   :  { %v3115_v61 = vunpack.c.h.bf16 %v3051_v17 }
 0xdda   :  { %3156 = vmatpush.bf16.msrb.mxu3 %v2780_v58  ;;  %v3114_v58 = vunpack.c.l.bf16 %v3051_v17 }
 0xdde   :  { %3157 = vmatpush.bf16.msrb.mxu3 %v2779_v62 }
 0xde2   :  { %3158 = vmatpush.bf16.msrb.mxu3 %v2778_v15 }
 0xe3c   :  { %v1682_v11 = vpop.f32.mrf.mxu2 }
 0xe48   :  { %v1888_v30 = vpop.f32.mrf.mxu3 }
 0xe49   :  { %v1897_v32 = vadd.f32 %v3087_v31, %v1888_v30 }
 0xe4b   :  { %3274 = vtanh.f32 %v1897_v32 }
 0xe50   :  { %v1890_v33 = vpop.f32.mrf.mxu3 }
 0xe51   :  { %v1898_v34 = vadd.f32 %v3088_v16, %v1890_v33  ;;  %v3275_v22 = vpop.eup %3274 }
 0xe52   :  { %v1901_v43 = vpack.c.bf16 %v3275_v22, %v3275_v22 }
 0xe53   :  { %3276 = vtanh.f32 %v1898_v34 }
 0xe54   :  { %v1907_v47 = vunpack.c.l.b16 %v1901_v43 }
 0xe59   :  { %v3277_v45 = vpop.eup %3276 }
 0xe5a   :  { %v1902_v46 = vpack.c.bf16 %v3277_v45, %v3277_v45  ;;  %v3092_v10 = vpack.c.bf16 %v3277_v45, %v3275_v22 }
 0xe5c   :  { %3093 = vst [vmem:[#allocation3 + $0x20] sm:$0xff] %v3092_v10   ;;  %v1908_v48 = vunpack.c.l.b16 %v1902_v46 }
 0xe5e   :  { %v1909_v49 = vpack.c.b16 %v1908_v48, %v1907_v47 }
 0xe60   :  { %1919 = vmatmul.bf16.vlgmr.msra.gmra.mxu0 %v1909_v49 }
 0xe63   :  { %v2789_v43 = vld [vmem:[#allocation3 + $0x20] sm:$0xff] }
 0xedd   :  { %v1920_v63 = vpop.f32.mrf.mxu0 }
 0xede   :  { %v1929_v1 = vadd.f32 %v3096_v0, %v1920_v63 }
 0xee0   :  { %3278 = vtanh.f32 %v1929_v1 }
 0xee5   :  { %v1922_v18 = vpop.f32.mrf.mxu0 }
 0xee6   :  { %v1930_v36 = vadd.f32 %v3097_v2, %v1922_v18  ;;  %v3279_v37 = vpop.eup %3278 }
 0xee7   :  { %v1933_v3 = vpack.c.bf16 %v3279_v37, %v3279_v37 }
 0xee8   :  { %3280 = vtanh.f32 %v1930_v36 }
 0xee9   :  { %v1939_v6 = vunpack.c.l.b16 %v1933_v3 }
 0xeee   :  { %v3281_v4 = vpop.eup %3280 }
 0xeef   :  { %v1934_v5 = vpack.c.bf16 %v3281_v4, %v3281_v4  ;;  %v3101_v39 = vpack.c.bf16 %v3281_v4, %v3279_v37 }
 0xef1   :  { %3102 = vst [vmem:[#allocation3 + $0x28] sm:$0xff] %v3101_v39   ;;  %v1940_v40 = vunpack.c.l.b16 %v1934_v5 }
 0xef3   :  { %v1941_v41 = vpack.c.b16 %v1940_v40, %v1939_v6 }
 0xef5   :  { %1951 = vmatmul.bf16.vlgmr.msra.gmra.mxu1 %v1941_v41 }
 0xef8   :  { %v2790_v48 = vld [vmem:[#allocation3 + $0x28] sm:$0xff] }
 0xf05   :  { %2173 = vmatmul.bf16.vlgmr.msrb.gmra.mxu1 %v2786_v7 }
 0xf15   :  { %2178 = vmatmul.bf16.gmra.mxu1 %v2787_v42 }
 0xf25   :  { %2183 = vmatmul.bf16.gmra.mxu1 %v2788_v57 }
 0xf72   :  { %v1952_v12 = vpop.f32.mrf.mxu1 }
 0xf73   :  { %v1961_v38 = vadd.f32 %v3105_v13, %v1952_v12  ;;  %v1684_v12 = vpop.f32.mrf.mxu2 }
 0xf74   :  { %v1685_v13 = vadd.f32 %v4011_v60, %v1684_v12 }
 0xf75   :  { %3282 = vtanh.f32 %v1961_v38  ;;  %v1683_v38 = vadd.f32 %v4011_v60, %v1682_v11 }
 0xf7a   :  { %v1954_v19 = vpop.f32.mrf.mxu1 }
 0xf7b   :  { %v1962_v20 = vadd.f32 %v3106_v14, %v1954_v19  ;;  %v3283_v21 = vpop.eup %3282  ;;  %v3056_v14 = vpack.c.bf16 %v1685_v13, %v1683_v38 }
 0xf7c   :  { %v1965_v24 = vpack.c.bf16 %v3283_v21, %v3283_v21 }
 0xf7d   :  { %3284 = vtanh.f32 %v1962_v20  ;;  %v3123_v20 = vunpack.c.l.bf16 %v3056_v14 }
 0xf7e   :  { %v1971_v30 = vunpack.c.l.b16 %v1965_v24  ;;  %v3124_v24 = vunpack.c.h.bf16 %v3056_v14 }
 0xf82   :  { %v2174_v25 = vpop.f32.mrf.mxu1 }
 0xf83   :  { %v3285_v26 = vpop.eup %3284  ;;  %v2175_v27 = vadd.f32 %v4081_v23, %v2174_v25 }
 0xf84   :  { %v1966_v28 = vpack.c.bf16 %v3285_v26, %v3285_v26  ;;  %v3110_v29 = vpack.c.bf16 %v3285_v26, %v3283_v21 }
 0xf85   :  { %2214 = vst [vmem:[%s4168_s17] sm:$0xff] %v2175_v27 }
 0xf86   :  { %3111 = vst [vmem:[#allocation3 + $0x8] sm:$0xff] %v3110_v29   ;;  %v1972_v31 = vunpack.c.l.b16 %v1966_v28 }
 0xf88   :  { %v1973_v32 = vpack.c.b16 %v1972_v31, %v1971_v30 }
 0xf8a   :  { %1983 = vmatmul.bf16.vlgmr.msra.gmra.mxu3 %v1973_v32  ;;  %v2176_v16 = vpop.f32.mrf.mxu1 }
 0xf8b   :  { %v2177_v33 = vadd.f32 %v4081_v23, %v2176_v16 }
 0xf8d   :  { %2215 = vst [vmem:[%s4168_s17 + $0x8] sm:$0xff] %v2177_v33  ;;  %v2791_v51 = vld [vmem:[#allocation3 + $0x8] sm:$0xff] }
 0xf92   :  { %v2179_v34 = vpop.f32.mrf.mxu1 }
 0xf93   :  { %v2180_v22 = vadd.f32 %v4081_v23, %v2179_v34 }
 0xf95   :  { %2216 = vst [vmem:[%s4168_s17 + $0x10] sm:$0xff] %v2180_v22 }
 0xf9a   :  { %v2181_v45 = vpop.f32.mrf.mxu1  ;;  %2188 = vmatmul.bf16.vlgmr.msrb.gmra.mxu3 %v2789_v43 }
 0xf9b   :  { %v2182_v46 = vadd.f32 %v4081_v23, %v2181_v45 }
 0xf9d   :  { %2217 = vst [vmem:[%s4168_s17 + $0x18] sm:$0xff] %v2182_v46 }
 0xfa2   :  { %v2184_v10 = vpop.f32.mrf.mxu1 }
 0xfa3   :  { %v2185_v47 = vadd.f32 %v4081_v23, %v2184_v10 }
 0xfa5   :  { %2218 = vst [vmem:[%s4168_s17 + $0x20] sm:$0xff] %v2185_v47 }
 0xfaa   :  { %v2186_v49 = vpop.f32.mrf.mxu1  ;;  %2193 = vmatmul.bf16.gmra.mxu3 %v2790_v48 }
 0xfab   :  { %v2187_v50 = vadd.f32 %v4081_v23, %v2186_v49 }
 0xfad   :  { %2219 = vst [vmem:[%s4168_s17 + $0x28] sm:$0xff] %v2187_v50 }
 0xfba   :  { %2198 = vmatmul.bf16.gmra.mxu3 %v2791_v51 }
0x100d   :  { %v1984_v56 = vpop.f32.mrf.mxu3 }
0x100e   :  { %v1993_v59 = vadd.f32 %v3114_v58, %v1984_v56 }
0x1010   :  { %3286 = vtanh.f32 %v1993_v59 }
0x1015   :  { %v1986_v62 = vpop.f32.mrf.mxu3 }
0x1016   :  { %v1994_v63 = vadd.f32 %v3115_v61, %v1986_v62  ;;  %v3287_v0 = vpop.eup %3286 }
0x1017   :  { %v1997_v15 = vpack.c.bf16 %v3287_v0, %v3287_v0 }
0x1018   :  { %3288 = vtanh.f32 %v1994_v63 }
0x1019   :  { %v2003_v3 = vunpack.c.l.b16 %v1997_v15 }
0x101d   :  { %v2189_v1 = vpop.f32.mrf.mxu3 }
0x101e   :  { %v3289_v2 = vpop.eup %3288  ;;  %v2190_v18 = vadd.f32 %v4081_v23, %v2189_v1 }
0x101f   :  { %v1998_v36 = vpack.c.bf16 %v3289_v2, %v3289_v2  ;;  %v3119_v37 = vpack.c.bf16 %v3289_v2, %v3287_v0 }
0x1020   :  { %2220 = vst [vmem:[%s4168_s17 + $0x30] sm:$0xff] %v2190_v18 }
0x1021   :  { %3120 = vst [vmem:[#allocation3 + $0x30] sm:$0xff] %v3119_v37   ;;  %v2004_v4 = vunpack.c.l.b16 %v1998_v36 }
0x1023   :  { %v2005_v5 = vpack.c.b16 %v2004_v4, %v2003_v3 }
0x1025   :  { %2015 = vmatmul.bf16.vlgmr.msrb.gmra.mxu0 %v2005_v5  ;;  %v2191_v39 = vpop.f32.mrf.mxu3 }
0x1026   :  { %v2192_v6 = vadd.f32 %v4081_v23, %v2191_v39 }
0x1028   :  { %2221 = vst [vmem:[%s4168_s17 + $0x38] sm:$0xff] %v2192_v6  ;;  %v2792_v40 = vld [vmem:[#allocation3 + $0x30] sm:$0xff] }
0x1029   :  { %2203 = vmatmul.bf16.gmra.mxu3 %v2792_v40 }
0x102d   :  { %v2194_v41 = vpop.f32.mrf.mxu3 }
0x102e   :  { %v2195_v7 = vadd.f32 %v4081_v23, %v2194_v41 }
0x1030   :  { %2222 = vst [vmem:[%s4168_s17 + $0x40] sm:$0xff] %v2195_v7 }
0x1035   :  { %v2196_v42 = vpop.f32.mrf.mxu3 }
0x1036   :  { %v2197_v57 = vadd.f32 %v4081_v23, %v2196_v42 }
0x1038   :  { %2223 = vst [vmem:[%s4168_s17 + $0x48] sm:$0xff] %v2197_v57 }
0x103d   :  { %v2199_v44 = vpop.f32.mrf.mxu3 }
0x103e   :  { %v2200_v8 = vadd.f32 %v4081_v23, %v2199_v44 }
0x1040   :  { %2224 = vst [vmem:[%s4168_s17 + $0x50] sm:$0xff] %v2200_v8 }
0x1045   :  { %v2201_v9 = vpop.f32.mrf.mxu3 }
0x1046   :  { %v2202_v35 = vadd.f32 %v4081_v23, %v2201_v9 }
0x1048   :  { %2225 = vst [vmem:[%s4168_s17 + $0x58] sm:$0xff] %v2202_v35 }
0x10a2   :  { %v2016_v19 = vpop.f32.mrf.mxu0 }
0x10a3   :  { %v2025_v21 = vadd.f32 %v3123_v20, %v2016_v19 }
0x10a5   :  { %3290 = vtanh.f32 %v2025_v21 }
0x10aa   :  { %v2018_v25 = vpop.f32.mrf.mxu0 }
0x10ab   :  { %v2026_v26 = vadd.f32 %v3124_v24, %v2018_v25  ;;  %v3291_v29 = vpop.eup %3290 }
0x10ac   :  { %v2204_v27 = vpop.f32.mrf.mxu3 }
0x10ad   :  { %3292 = vtanh.f32 %v2026_v26  ;;  %v2205_v28 = vadd.f32 %v4081_v23, %v2204_v27 }
0x10af   :  { %2226 = vst [vmem:[%s4168_s17 + $0x60] sm:$0xff] %v2205_v28 }
0x10b3   :  { %v3293_v30 = vpop.eup %3292 }
0x10b4   :  { %v3128_v31 = vpack.c.bf16 %v3293_v30, %v3291_v29  ;;  %v2206_v60 = vpop.f32.mrf.mxu3 }
0x10b5   :  { %v2207_v32 = vadd.f32 %v4081_v23, %v2206_v60 }
0x10b6   :  { %3129 = vst [vmem:[#allocation3 + $0x38] sm:$0xff] %v3128_v31  }
0x10b7   :  { %2227 = vst [vmem:[%s4168_s17 + $0x68] sm:$0xff] %v2207_v32 }
0x10bd   :  { %v2793_v16 = vld [vmem:[#allocation3 + $0x38] sm:$0xff] }
0x10be   :  { %2208 = vmatmul.bf16.gmra.mxu3 %v2793_v16 }
0x1141   :  { %v2209_v33 = vpop.f32.mrf.mxu3 }
0x1142   :  { %v2210_v34 = vadd.f32 %v4081_v23, %v2209_v33 }
0x1144   :  { %2228 = vst [vmem:[%s4168_s17 + $0x70] sm:$0xff] %v2210_v34 }
0x1149   :  { %v2211_v22 = vpop.f32.mrf.mxu3 }
0x114a   :  { %v2212_v43 = vadd.f32 %v4081_v23, %v2211_v22 }
0x114c   :  { %2229 = vst [vmem:[%s4168_s17 + $0x78] sm:$0xff] %v2212_v43 }

</bundles_post_ra>
